<compile_context>
chip_gen: v5e
topology: v5e:2x2
jax: 0.10.0
libtpu: 0.0.40
codegen_flags: <defaults>
</compile_context>

<pallas_src>
import jax
import jax.numpy as jnp
from jax.experimental import pallas as pl
from jax.experimental.pallas import tpu as pltpu

_LANE = 128
_SUBLANE = 8


def _round_up(n, m):
    return ((n + m - 1) // m) * m


def _vae_kernel(
    x_ref,            # (TB, DP)  flattened, zero-padded input tile
    eps_ref,          # (TB, ZP)  standard-normal noise (zero-padded lanes)
    we1_ref, be1_ref,     # (DP, HP), (1, HP)
    whead_ref, bhead_ref, # (HP, 2*ZP), (1, 2*ZP)   fused [Wmu | Wlv]
    wd1_ref, bd1_ref,     # (ZP, HP), (1, HP)
    wd2_ref, bd2_ref,     # (HP, DP), (1, DP)
    xhat_ref,         # out: (TB, DP)
    z_ref,            # out: (TB, ZP)  lane-dense latent
):
    zp = z_ref.shape[-1]
    x = x_ref[...]

    # ----- encoder trunk -----
    h1 = jnp.dot(x, we1_ref[...], preferred_element_type=jnp.float32)
    h1 = jnp.maximum(h1 + be1_ref[...].astype(jnp.float32), 0.0)

    # ----- fused mean / log_var head (single MXU push) -----
    head = jnp.dot(h1.astype(whead_ref.dtype), whead_ref[...],
                   preferred_element_type=jnp.float32)
    head = head + bhead_ref[...].astype(jnp.float32)
    mean = head[:, :zp]          # lane-aligned slices (zp is a multiple of 128)
    log_var = head[:, zp:]

    # ----- reparameterization: z = mean + exp(0.5 * log_var) * eps -----
    z = mean + jnp.exp(0.5 * log_var) * eps_ref[...].astype(jnp.float32)
    z_ref[...] = z.astype(z_ref.dtype)

    # ----- decoder -----
    h2 = jnp.dot(z.astype(wd1_ref.dtype), wd1_ref[...],
                 preferred_element_type=jnp.float32)
    h2 = jnp.maximum(h2 + bd1_ref[...].astype(jnp.float32), 0.0)

    logits = jnp.dot(h2.astype(wd2_ref.dtype), wd2_ref[...],
                     preferred_element_type=jnp.float32)
    logits = logits + bd2_ref[...].astype(jnp.float32)
    xhat_ref[...] = jax.nn.sigmoid(logits).astype(xhat_ref.dtype)


def _pad2(a, rows, cols):
    r, c = a.shape
    return jnp.pad(a, ((0, rows - r), (0, cols - c)))


def vae_forward(x_nchw, params, eps, *, max_batch_tile=128):
    """Runs the fused VAE forward pass. Returns (x_hat in NCHW, z)."""
    B, C, H, W = x_nchw.shape
    D = C * H * W
    Z = eps.shape[1]
    Hh = params["we1"].shape[1]

    # Padded (lane/sublane aligned) dimensions.
    DP = _round_up(D, _LANE)
    HP = _round_up(Hh, _LANE)
    ZP = _round_up(Z, _LANE)
    TB = min(max_batch_tile, _round_up(B, _SUBLANE))
    B_pad = _round_up(B, TB)
    n_tiles = B_pad // TB

    # ----- pad activations -----
    x_flat = x_nchw.reshape(B, D)                     # same as torch .view(B, -1)
    x_p = _pad2(x_flat, B_pad, DP)
    eps_p = _pad2(eps, B_pad, ZP)

    # ----- pad + fuse parameters (zero padding is mathematically neutral) -----
    we1 = _pad2(params["we1"], DP, HP)
    be1 = _pad2(params["be1"], 1, HP)
    wmu = _pad2(params["wmu"], HP, ZP)
    wlv = _pad2(params["wlv"], HP, ZP)
    whead = jnp.concatenate([wmu, wlv], axis=1)       # (HP, 2*ZP)
    bhead = jnp.concatenate([_pad2(params["bmu"], 1, ZP),
                             _pad2(params["blv"], 1, ZP)], axis=1)
    wd1 = _pad2(params["wd1"], ZP, HP)
    bd1 = _pad2(params["bd1"], 1, HP)
    wd2 = _pad2(params["wd2"], HP, DP)
    bd2 = _pad2(params["bd2"], 1, DP)

    weights = (we1, be1, whead, bhead, wd1, bd1, wd2, bd2)

    # ----- specs: batch tiles pipelined over the grid, weights VMEM-resident -----
    def batch_spec(cols):
        return pl.BlockSpec((TB, cols), lambda i: (i, 0))

    def resident_spec(arr):
        return pl.BlockSpec(arr.shape, lambda i: (0, 0))

    in_specs = [batch_spec(DP), batch_spec(ZP)] + [resident_spec(w) for w in weights]
    out_specs = (batch_spec(DP), batch_spec(ZP))

    # ----- VMEM budget / cost hints -----
    itemsize = 4
    w_bytes = sum(int(w.size) for w in weights) * itemsize
    act_bytes = 2 * TB * (DP + ZP) * itemsize          # in tile + out tile
    vmem_limit = min(100 * 1024 * 1024,
                     max(32 * 1024 * 1024, 2 * (w_bytes + act_bytes) + (4 << 20)))

    flops = 2 * B_pad * (DP * HP + HP * (2 * ZP) + ZP * HP + HP * DP)
    transcendentals = B_pad * (ZP + DP)                # exp (reparam) + sigmoid
    bytes_accessed = w_bytes + 2 * B_pad * (DP + ZP) * itemsize

    x_hat_p, z_p = pl.pallas_call(
        _vae_kernel,
        out_shape=(
            jax.ShapeDtypeStruct((B_pad, DP), jnp.float32),
            jax.ShapeDtypeStruct((B_pad, ZP), jnp.float32),
        ),
        grid=(n_tiles,),
        in_specs=in_specs,
        out_specs=out_specs,
        compiler_params=pltpu.CompilerParams(
            dimension_semantics=("parallel",),
            vmem_limit_bytes=int(vmem_limit),
        ),
        cost_estimate=pl.CostEstimate(
            flops=int(flops),
            transcendentals=int(transcendentals),
            bytes_accessed=int(bytes_accessed),
        ),
    )(x_p, eps_p, *weights)

    x_hat = x_hat_p[:B, :D].reshape(B, C, H, W)
    z = z_p[:B, :Z]
    return x_hat, z


def init_params(key, d_in, hidden, latent):
    """Deterministic synthetic parameter initialization (no checkpoint load)."""
    ks = jax.random.split(key, 5)

    def lin(kw, fan_in, fan_out):
        scale = 1.0 / jnp.sqrt(fan_in)
        return jax.random.normal(kw, (fan_in, fan_out), jnp.float32) * scale

    return {
        "we1": lin(ks[0], d_in, hidden),
        "be1": jnp.zeros((1, hidden), jnp.float32),
        "wmu": lin(ks[1], hidden, latent),
        "bmu": jnp.zeros((1, latent), jnp.float32),
        "wlv": lin(ks[2], hidden, latent),
        "blv": jnp.zeros((1, latent), jnp.float32),
        "wd1": lin(ks[3], latent, hidden),
        "bd1": jnp.zeros((1, hidden), jnp.float32),
        "wd2": lin(ks[4], hidden, d_in),
        "bd2": jnp.zeros((1, d_in), jnp.float32),
    }


if __name__ == "__main__":
    # Small shapes consistent with the module's forward:
    #   x: (B=2, C=4, H=16, W=16) NCHW  ->  flattened D = 1024
    B, C, H, W = 2, 4, 16, 16
    D = C * H * W
    HIDDEN = 32
    LATENT = 8

    root = jax.random.PRNGKey(0)
    k_x, k_eps, k_p = jax.random.split(root, 3)

    x = jax.random.normal(k_x, (B, C, H, W), jnp.float32)
    # epsilon ~ N(0,1) for the reparameterization trick (torch.randn_like(var))
    eps = jax.random.normal(k_eps, (B, LATENT), jnp.float32)
    params = init_params(k_p, D, HIDDEN, LATENT)

    x_hat, z = vae_forward(x, params, eps)
    jax.block_until_ready((x_hat, z))

    # Reference check in plain JAX (same math, unpadded).
    x_flat = x.reshape(B, D)
    h1 = jnp.maximum(x_flat @ params["we1"] + params["be1"], 0.0)
    mean = h1 @ params["wmu"] + params["bmu"]
    log_var = h1 @ params["wlv"] + params["blv"]
    z_ref = mean + jnp.exp(0.5 * log_var) * eps
    h2 = jnp.maximum(z_ref @ params["wd1"] + params["bd1"], 0.0)
    x_hat_ref = jax.nn.sigmoid(h2 @ params["wd2"] + params["bd2"]).reshape(B, C, H, W)

    assert x_hat.shape == (B, C, H, W) and z.shape == (B, LATENT)
    assert jnp.allclose(z, z_ref, atol=1e-5, rtol=1e-5)
    assert jnp.allclose(x_hat, x_hat_ref, atol=1e-5, rtol=1e-5)

    print("KERNEL_OK")
</pallas_src>

<mosaic_0001>
module attributes {stable_mosaic.version = 11 : i64} {
  func.func @_vae_kernel(%arg0: i32, %arg1: memref<8x1024xf32, #tpu.memory_space<vmem>>, %arg2: memref<8x128xf32, #tpu.memory_space<vmem>>, %arg3: memref<1024x128xf32, #tpu.memory_space<vmem>>, %arg4: memref<1x128xf32, #tpu.memory_space<vmem>>, %arg5: memref<128x256xf32, #tpu.memory_space<vmem>>, %arg6: memref<1x256xf32, #tpu.memory_space<vmem>>, %arg7: memref<128x128xf32, #tpu.memory_space<vmem>>, %arg8: memref<1x128xf32, #tpu.memory_space<vmem>>, %arg9: memref<128x1024xf32, #tpu.memory_space<vmem>>, %arg10: memref<1x1024xf32, #tpu.memory_space<vmem>>, %arg11: memref<8x1024xf32, #tpu.memory_space<vmem>>, %arg12: memref<8x128xf32, #tpu.memory_space<vmem>>) attributes {dimension_semantics = [#tpu.dimension_semantics<parallel>], iteration_bounds = array<i64: 1>, scalar_prefetch = 0 : i64, scratch_operands = 0 : i64, tpu.core_type = #tpu.core_type<tc>, window_params = [{transform_indices = @transform_0, window_bounds = array<i64: 8, 1024>}, {transform_indices = @transform_1, window_bounds = array<i64: 8, 128>}, {pipeline_mode = #tpu.pipeline_mode<synchronous>, transform_indices = @transform_2, window_bounds = array<i64: 1024, 128>}, {pipeline_mode = #tpu.pipeline_mode<synchronous>, transform_indices = @transform_3, window_bounds = array<i64: 1, 128>}, {pipeline_mode = #tpu.pipeline_mode<synchronous>, transform_indices = @transform_4, window_bounds = array<i64: 128, 256>}, {pipeline_mode = #tpu.pipeline_mode<synchronous>, transform_indices = @transform_5, window_bounds = array<i64: 1, 256>}, {pipeline_mode = #tpu.pipeline_mode<synchronous>, transform_indices = @transform_6, window_bounds = array<i64: 128, 128>}, {pipeline_mode = #tpu.pipeline_mode<synchronous>, transform_indices = @transform_7, window_bounds = array<i64: 1, 128>}, {pipeline_mode = #tpu.pipeline_mode<synchronous>, transform_indices = @transform_8, window_bounds = array<i64: 128, 1024>}, {pipeline_mode = #tpu.pipeline_mode<synchronous>, transform_indices = @transform_9, window_bounds = array<i64: 1, 1024>}, {transform_indices = @transform_10, window_bounds = array<i64: 8, 1024>}, {transform_indices = @transform_11, window_bounds = array<i64: 8, 128>}]} {
    %c0 = arith.constant 0 : index
    %c0_0 = arith.constant 0 : index
    %0 = vector.load %arg1[%c0, %c0_0] : memref<8x1024xf32, #tpu.memory_space<vmem>>, vector<8x1024xf32>
    %c0_1 = arith.constant 0 : index
    %c0_2 = arith.constant 0 : index
    %1 = vector.load %arg3[%c0_1, %c0_2] : memref<1024x128xf32, #tpu.memory_space<vmem>>, vector<1024x128xf32>
    %cst = arith.constant dense<0.000000e+00> : vector<8x128xf32>
    %2 = tpu.matmul %0, %1, %cst {dimension_numbers = #tpu.dot_dimension_numbers<[1], [0], [0], [1], [0, 0, 1, 1], [], []>} : vector<8x1024xf32>, vector<1024x128xf32>, vector<8x128xf32> -> vector<8x128xf32>
    %c0_3 = arith.constant 0 : index
    %c0_4 = arith.constant 0 : index
    %3 = vector.load %arg4[%c0_3, %c0_4] : memref<1x128xf32, #tpu.memory_space<vmem>>, vector<1x128xf32>
    %4 = vector.broadcast %3 : vector<1x128xf32> to vector<8x128xf32>
    %5 = arith.addf %2, %4 : vector<8x128xf32>
    %cst_5 = arith.constant 0.000000e+00 : f32
    %6 = vector.broadcast %cst_5 : f32 to vector<8x128xf32>
    %7 = arith.maximumf %5, %6 : vector<8x128xf32>
    %c0_6 = arith.constant 0 : index
    %c0_7 = arith.constant 0 : index
    %8 = vector.load %arg5[%c0_6, %c0_7] : memref<128x256xf32, #tpu.memory_space<vmem>>, vector<128x256xf32>
    %cst_8 = arith.constant dense<0.000000e+00> : vector<8x256xf32>
    %9 = tpu.matmul %7, %8, %cst_8 {dimension_numbers = #tpu.dot_dimension_numbers<[1], [0], [0], [1], [0, 0, 1, 1], [], []>} : vector<8x128xf32>, vector<128x256xf32>, vector<8x256xf32> -> vector<8x256xf32>
    %c0_9 = arith.constant 0 : index
    %c0_10 = arith.constant 0 : index
    %10 = vector.load %arg6[%c0_9, %c0_10] : memref<1x256xf32, #tpu.memory_space<vmem>>, vector<1x256xf32>
    %11 = vector.broadcast %10 : vector<1x256xf32> to vector<8x256xf32>
    %12 = arith.addf %9, %11 : vector<8x256xf32>
    %13 = vector.extract_strided_slice %12 {offsets = [0, 0], sizes = [8, 128], strides = [1, 1]} : vector<8x256xf32> to vector<8x128xf32>
    %14 = vector.extract_strided_slice %12 {offsets = [0, 128], sizes = [8, 128], strides = [1, 1]} : vector<8x256xf32> to vector<8x128xf32>
    %cst_11 = arith.constant 5.000000e-01 : f32
    %15 = vector.broadcast %cst_11 : f32 to vector<8x128xf32>
    %16 = arith.mulf %15, %14 : vector<8x128xf32>
    %17 = math.exp %16 : vector<8x128xf32>
    %c0_12 = arith.constant 0 : index
    %c0_13 = arith.constant 0 : index
    %18 = vector.load %arg2[%c0_12, %c0_13] : memref<8x128xf32, #tpu.memory_space<vmem>>, vector<8x128xf32>
    %19 = arith.mulf %17, %18 : vector<8x128xf32>
    %20 = arith.addf %13, %19 : vector<8x128xf32>
    %c0_14 = arith.constant 0 : index
    %c0_15 = arith.constant 0 : index
    %21 = vector.load %arg12[%c0_14, %c0_15] : memref<8x128xf32, #tpu.memory_space<vmem>>, vector<8x128xf32>
    tpu.vector_store %arg12[%c0_14, %c0_15], %20 {strides = array<i32>} : memref<8x128xf32, #tpu.memory_space<vmem>>, vector<8x128xf32>,
    %c0_16 = arith.constant 0 : index
    %c0_17 = arith.constant 0 : index
    %22 = vector.load %arg7[%c0_16, %c0_17] : memref<128x128xf32, #tpu.memory_space<vmem>>, vector<128x128xf32>
    %cst_18 = arith.constant dense<0.000000e+00> : vector<8x128xf32>
    %23 = tpu.matmul %20, %22, %cst_18 {dimension_numbers = #tpu.dot_dimension_numbers<[1], [0], [0], [1], [0, 0, 1, 1], [], []>} : vector<8x128xf32>, vector<128x128xf32>, vector<8x128xf32> -> vector<8x128xf32>
    %c0_19 = arith.constant 0 : index
    %c0_20 = arith.constant 0 : index
    %24 = vector.load %arg8[%c0_19, %c0_20] : memref<1x128xf32, #tpu.memory_space<vmem>>, vector<1x128xf32>
    %25 = vector.broadcast %24 : vector<1x128xf32> to vector<8x128xf32>
    %26 = arith.addf %23, %25 : vector<8x128xf32>
    %cst_21 = arith.constant 0.000000e+00 : f32
    %27 = vector.broadcast %cst_21 : f32 to vector<8x128xf32>
    %28 = arith.maximumf %26, %27 : vector<8x128xf32>
    %c0_22 = arith.constant 0 : index
    %c0_23 = arith.constant 0 : index
    %29 = vector.load %arg9[%c0_22, %c0_23] : memref<128x1024xf32, #tpu.memory_space<vmem>>, vector<128x1024xf32>
    %cst_24 = arith.constant dense<0.000000e+00> : vector<8x1024xf32>
    %30 = tpu.matmul %28, %29, %cst_24 {dimension_numbers = #tpu.dot_dimension_numbers<[1], [0], [0], [1], [0, 0, 1, 1], [], []>} : vector<8x128xf32>, vector<128x1024xf32>, vector<8x1024xf32> -> vector<8x1024xf32>
    %c0_25 = arith.constant 0 : index
    %c0_26 = arith.constant 0 : index
    %31 = vector.load %arg10[%c0_25, %c0_26] : memref<1x1024xf32, #tpu.memory_space<vmem>>, vector<1x1024xf32>
    %32 = vector.broadcast %31 : vector<1x1024xf32> to vector<8x1024xf32>
    %33 = arith.addf %30, %32 : vector<8x1024xf32>
    %34 = arith.negf %33 : vector<8x1024xf32>
    %35 = math.exp %34 : vector<8x1024xf32>
    %cst_27 = arith.constant 1.000000e+00 : f32
    %36 = vector.broadcast %cst_27 : f32 to vector<8x1024xf32>
    %37 = arith.addf %36, %35 : vector<8x1024xf32>
    %38 = arith.divf %36, %37 : vector<8x1024xf32>
    %c0_28 = arith.constant 0 : index
    %c0_29 = arith.constant 0 : index
    %39 = vector.load %arg11[%c0_28, %c0_29] : memref<8x1024xf32, #tpu.memory_space<vmem>>, vector<8x1024xf32>
    tpu.vector_store %arg11[%c0_28, %c0_29], %38 {strides = array<i32>} : memref<8x1024xf32, #tpu.memory_space<vmem>>, vector<8x1024xf32>,
    return
  }
  func.func @transform_0(%arg0: i32) -> (i32, i32) {
    %c0_i32 = arith.constant 0 : i32
    %c0_i32_0 = arith.constant 0 : i32
    return %arg0, %c0_i32 : i32, i32
  }
  func.func @transform_1(%arg0: i32) -> (i32, i32) {
    %c0_i32 = arith.constant 0 : i32
    %c0_i32_0 = arith.constant 0 : i32
    return %arg0, %c0_i32 : i32, i32
  }
  func.func @transform_2(%arg0: i32) -> (i32, i32) {
    %c0_i32 = arith.constant 0 : i32
    %c0_i32_0 = arith.constant 0 : i32
    %c0_i32_1 = arith.constant 0 : i32
    return %c0_i32, %c0_i32_0 : i32, i32
  }
  func.func @transform_3(%arg0: i32) -> (i32, i32) {
    %c0_i32 = arith.constant 0 : i32
    %c0_i32_0 = arith.constant 0 : i32
    %c0_i32_1 = arith.constant 0 : i32
    return %c0_i32, %c0_i32_0 : i32, i32
  }
  func.func @transform_4(%arg0: i32) -> (i32, i32) {
    %c0_i32 = arith.constant 0 : i32
    %c0_i32_0 = arith.constant 0 : i32
    %c0_i32_1 = arith.constant 0 : i32
    return %c0_i32, %c0_i32_0 : i32, i32
  }
  func.func @transform_5(%arg0: i32) -> (i32, i32) {
    %c0_i32 = arith.constant 0 : i32
    %c0_i32_0 = arith.constant 0 : i32
    %c0_i32_1 = arith.constant 0 : i32
    return %c0_i32, %c0_i32_0 : i32, i32
  }
  func.func @transform_6(%arg0: i32) -> (i32, i32) {
    %c0_i32 = arith.constant 0 : i32
    %c0_i32_0 = arith.constant 0 : i32
    %c0_i32_1 = arith.constant 0 : i32
    return %c0_i32, %c0_i32_0 : i32, i32
  }
  func.func @transform_7(%arg0: i32) -> (i32, i32) {
    %c0_i32 = arith.constant 0 : i32
    %c0_i32_0 = arith.constant 0 : i32
    %c0_i32_1 = arith.constant 0 : i32
    return %c0_i32, %c0_i32_0 : i32, i32
  }
  func.func @transform_8(%arg0: i32) -> (i32, i32) {
    %c0_i32 = arith.constant 0 : i32
    %c0_i32_0 = arith.constant 0 : i32
    %c0_i32_1 = arith.constant 0 : i32
    return %c0_i32, %c0_i32_0 : i32, i32
  }
  func.func @transform_9(%arg0: i32) -> (i32, i32) {
    %c0_i32 = arith.constant 0 : i32
    %c0_i32_0 = arith.constant 0 : i32
    %c0_i32_1 = arith.constant 0 : i32
    return %c0_i32, %c0_i32_0 : i32, i32
  }
  func.func @transform_10(%arg0: i32) -> (i32, i32) {
    %c0_i32 = arith.constant 0 : i32
    %c0_i32_0 = arith.constant 0 : i32
    return %arg0, %c0_i32 : i32, i32
  }
  func.func @transform_11(%arg0: i32) -> (i32, i32) {
    %c0_i32 = arith.constant 0 : i32
    %c0_i32_0 = arith.constant 0 : i32
    return %arg0, %c0_i32 : i32, i32
  }
}

</mosaic_0001>

<bundles_post_ra>
// kernel: tpu_custom_call.1
= control target key start
LH: loop header
LB: loop body
LE: loop exit
PB: predicated region body
PF: predicated region fallthrough
CT: control target
= control target key end

     0   :  { %17 = vsyncpa [#allocation3], 0  ;;  %s1621_s0 = inlined_call_operand.hbm [shape: f32[8,1024], index: 0, kind: input, shape index: {}]   ;;  %s1622_s1 = inlined_call_operand.hbm [shape: f32[8,128], index: 1, kind: input, shape index: {}]   ;;  %s1623_s2 = inlined_call_operand.hbm [shape: f32[1024,128], index: 2, kind: input, shape index: {}]   ;;  %s1624_s3 = inlined_call_operand.hbm [shape: f32[1,128], index: 3, kind: input, shape index: {}]   ;;  %s1625_s4 = inlined_call_operand.hbm [shape: f32[128,256], index: 4, kind: input, shape index: {}]   ;;  %s1626_s5 = inlined_call_operand.hbm [shape: f32[1,256], index: 5, kind: input, shape index: {}]   ;;  %s1627_s6 = inlined_call_operand.hbm [shape: f32[128,128], index: 6, kind: input, shape index: {}]   ;;  %s1628_s7 = inlined_call_operand.hbm [shape: f32[1,128], index: 7, kind: input, shape index: {}]   ;;  %s1629_s8 = inlined_call_operand.hbm [shape: f32[128,1024], index: 8, kind: input, shape index: {}]   ;;  %s1630_s9 = inlined_call_operand.vmem [shape: f32[1,1024], index: 9, kind: input, shape index: {}]   ;;  %s1631_s10 = inlined_call_operand.hbm [shape: f32[8,1024], index: 10, kind: output, shape index: {0}]   ;;  %s1632_s11 = inlined_call_operand.hbm [shape: f32[8,128], index: 11, kind: output, shape index: {1}]  }
   0x1   :  { %18 = vsyncpa [#allocation6], 0 }
   0x2   :  { %19 = vsyncpa [#allocation9], 0 }
   0x3   :  { %20 = vsyncpa [#allocation12], 0 }
   0x4   :  { %21 = vsyncpa [#allocation15], 0 }
   0x5   :  { %22 = vsyncpa [#allocation4], 0  ;;  %s40_s19 = sshll.u32 %s1622_s1, 4  ;;  %s41_s19 = int_to_ptr.hbm [resolvable:$true] %s40_s19 }
   0x6   :  { %23 = vsyncpa [#allocation19], 0  ;;  %s1438_s20 = smov [#allocation5]   ;;  %s64_s24 = sshll.u32 %s1624_s3, 4  ;;  %s65_s24 = int_to_ptr.hbm [resolvable:$true] %s64_s24 }
   0x7   :  { %s42_s21 = sshll.u32 %s1438_s20, 4  ;;  %s1439_s25 = smov [#allocation8]   ;;  %s43_s21 = int_to_ptr.vmem [resolvable:$true] %s42_s21 }
   0x8   :  { %45 = dma.hbm_to_vmem [thread:$0]  %s41_s19, 128, %s43_s21, [#allocation6]  }
   0x9   :  { %s66_s26 = sshll.u32 %s1439_s25, 4  ;;  %s88_s29 = sshll.u32 %s1626_s5, 4  ;;  %s67_s26 = int_to_ptr.vmem [resolvable:$true] %s66_s26  ;;  %s89_s29 = int_to_ptr.hbm [resolvable:$true] %s88_s29 }
   0xa   :  { %69 = dma.hbm_to_vmem [thread:$0]  %s65_s24, 16, %s67_s26, [#allocation9]  }
   0xb   :  { %s112_s12 = sshll.u32 %s1628_s7, 4  ;;  %s1440_s13 = smov [#allocation11]   ;;  %s113_s12 = int_to_ptr.hbm [resolvable:$true] %s112_s12 }
   0xc   :  { %s90_s14 = sshll.u32 %s1440_s13, 4  ;;  %s1441_s3 = smov [#allocation14]   ;;  %s91_s14 = int_to_ptr.vmem [resolvable:$true] %s90_s14 }
   0xd   :  { %93 = dma.hbm_to_vmem [thread:$0]  %s89_s29, 32, %s91_s14, [#allocation12]  }
   0xe   :  { %s114_s15 = sshll.u32 %s1441_s3, 4  ;;  %s29_s18 = sshll.u32 %s1621_s0, 4  ;;  %s115_s15 = int_to_ptr.vmem [resolvable:$true] %s114_s15  ;;  %s30_s18 = int_to_ptr.hbm [resolvable:$true] %s29_s18 }
   0xf   :  { %117 = dma.hbm_to_vmem [thread:$0]  %s113_s12, 16, %s115_s15, [#allocation15]  }
  0x10   :  { %s50_s20 = sshll.u32 %s1623_s2, 4  ;;  %s1442_s21 = smov [#allocation2]   ;;  %s51_s20 = int_to_ptr.hbm [resolvable:$true] %s50_s20 }
  0x11   :  { %s31_s7 = sshll.u32 %s1442_s21, 4  ;;  %s1443_s22 = smov [#allocation7]   ;;  %s32_s7 = int_to_ptr.vmem [resolvable:$true] %s31_s7 }
  0x12   :  { %34 = dma.hbm_to_vmem [thread:$0]  %s30_s18, 1024, %s32_s7, [#allocation3]  }
  0x13   :  { %s52_s23 = sshll.u32 %s1443_s22, 4  ;;  %s1444_s24 = smov 128   ;;  %s53_s23 = int_to_ptr.vmem [resolvable:$true] %s52_s23 }
  0x14   :  { %s1445_s25 = smov 8   ;;  %s74_s27 = sshll.u32 %s1625_s4, 4  ;;  %s75_s27 = int_to_ptr.hbm [resolvable:$true] %s74_s27 }
  0x15   :  { %58 = dma.hbm_to_vmem [thread:$0]  %s51_s20, 16384, %s53_s23, [#allocation6], %s1444_s24, %s1444_s24, %s1445_s25  }
  0x16   :  { %s1446_s28 = smov [#allocation10]   ;;  %s98_s30 = sshll.u32 %s1627_s6, 4  ;;  %s99_s30 = int_to_ptr.hbm [resolvable:$true] %s98_s30 }
  0x17   :  { %s76_s29 = sshll.u32 %s1446_s28, 4  ;;  %s1447_s12 = smov 256   ;;  %s77_s29 = int_to_ptr.vmem [resolvable:$true] %s76_s29 }
  0x18   :  { %s1448_s13 = smov 16   ;;  %s1449_s14 = smov [#allocation13]  }
  0x19   :  { %82 = dma.hbm_to_vmem [thread:$0]  %s75_s27, 4096, %s77_s29, [#allocation9], %s1447_s12, %s1447_s12, %s1448_s13  }
  0x1a   :  { %s100_s3 = sshll.u32 %s1449_s14, 4  ;;  %s122_s17 = sshll.u32 %s1629_s8, 4  ;;  %s101_s3 = int_to_ptr.vmem [resolvable:$true] %s100_s3  ;;  %s123_s17 = int_to_ptr.hbm [resolvable:$true] %s122_s17 }
  0x1b   :  { %106 = dma.hbm_to_vmem [thread:$0]  %s99_s30, 2048, %s101_s3, [#allocation12], %s1444_s24, %s1444_s24, %s1445_s25  }
  0x1c   :  { %s1450_s4 = smov [#allocation16]   ;;  %s1451_s5 = smov 1024  }
  0x1d   :  { %s124_s18 = sshll.u32 %s1450_s4, 4  ;;  %s1452_s19 = smov 64   ;;  %s125_s18 = int_to_ptr.vmem [resolvable:$true] %s124_s18 }
  0x1e   :  { %130 = dma.hbm_to_vmem [thread:$0]  %s123_s17, 16384, %s125_s18, [#allocation15], %s1451_s5, %s1451_s5, %s1452_s19  }
  0x1f   :  { %1424 = dma.done.wait [#allocation3], 1024  }
  0x20   :  { %1425 = vsyncadd [#allocation3], 4294966272 }
  0x21   :  { %1426 = dma.done.wait [#allocation6], 16512  }
  0x22   :  { %1427 = vsyncadd [#allocation6], 4294950784 }
  0x23   :  { %1428 = dma.done.wait [#allocation9], 4112  }
  0x24   :  { %1429 = vsyncadd [#allocation9], 4294963184 }
  0x25   :  { %1430 = dma.done.wait [#allocation12], 2080  }
  0x26   :  { %1431 = vsyncadd [#allocation12], 4294965216 }
  0x27   :  { %1432 = dma.done.wait [#allocation15], 16400  }
  0x28   :  { %1433 = vsyncadd [#allocation15], 4294950896  ;;  %v224_v0 = vld [vmem:[#allocation7 + $0x178] sm:$0xff]  ;;  %v223_v2 = vld [vmem:[#allocation7 + $0x170] sm:$0xff]  ;;  %s1453_s6 = smov [#allocation18]   ;;  %s1080_s7 = sshll.u32 %s1632_s11, 4  ;;  %s1081_s7 = int_to_ptr.hbm [resolvable:$true] %s1080_s7 }
  0x29   :  { %v192_v1 = vld [vmem:[#allocation7 + $0x78] sm:$0xff]  ;;  %349 = vmatpush.msra.mxu2 %v224_v0  ;;  %v191_v4 = vld [vmem:[#allocation7 + $0x70] sm:$0xff]  ;;  %v222_v6 = vld [vmem:[#allocation7 + $0x168] sm:$0xff]  ;;  %s1078_s8 = sshll.u32 %s1453_s6, 4  ;;  %s1069_s26 = sshll.u32 %s1631_s10, 4  ;;  %s1079_s8 = int_to_ptr.vmem [resolvable:$true] %s1078_s8  ;;  %s1070_s26 = int_to_ptr.hbm [resolvable:$true] %s1069_s26 }
  0x2a   :  { %309 = vmatpush.msra.mxu0 %v192_v1  ;;  %v240_v3 = vld [vmem:[#allocation7 + $0x1f8] sm:$0xff]  ;;  %v239_v7 = vld [vmem:[#allocation7 + $0x1f0] sm:$0xff]  ;;  %v190_v8 = vld [vmem:[#allocation7 + $0x68] sm:$0xff] }
  0x2b   :  { %v208_v5 = vld [vmem:[#allocation7 + $0xf8] sm:$0xff]  ;;  %369 = vmatpush.msra.mxu3 %v240_v3  ;;  %350 = vmatpush.msra.mxu2 %v223_v2  ;;  %v207_v9 = vld [vmem:[#allocation7 + $0xf0] sm:$0xff]  ;;  %v238_v10 = vld [vmem:[#allocation7 + $0x1e8] sm:$0xff] }
  0x2c   :  { %329 = vmatpush.msra.mxu1 %v208_v5  ;;  %310 = vmatpush.msra.mxu0 %v191_v4  ;;  %v221_v11 = vld [vmem:[#allocation7 + $0x160] sm:$0xff]  ;;  %v206_v13 = vld [vmem:[#allocation7 + $0xe8] sm:$0xff]  ;;  %v220_v16 = vld [vmem:[#allocation7 + $0x158] sm:$0xff] }
  0x2d   :  { %370 = vmatpush.msra.mxu3 %v239_v7  ;;  %v189_v12 = vld [vmem:[#allocation7 + $0x60] sm:$0xff]  ;;  %351 = vmatpush.msra.mxu2 %v222_v6  ;;  %v188_v17 = vld [vmem:[#allocation7 + $0x58] sm:$0xff]  ;;  %v219_v20 = vld [vmem:[#allocation7 + $0x150] sm:$0xff] }
  0x2e   :  { %330 = vmatpush.msra.mxu1 %v207_v9  ;;  %311 = vmatpush.msra.mxu0 %v190_v8  ;;  %v237_v14 = vld [vmem:[#allocation7 + $0x1e0] sm:$0xff]  ;;  %v236_v18 = vld [vmem:[#allocation7 + $0x1d8] sm:$0xff]  ;;  %v187_v21 = vld [vmem:[#allocation7 + $0x50] sm:$0xff] }
  0x2f   :  { %v205_v15 = vld [vmem:[#allocation7 + $0xe0] sm:$0xff]  ;;  %371 = vmatpush.msra.mxu3 %v238_v10  ;;  %352 = vmatpush.msra.mxu2 %v221_v11  ;;  %v204_v19 = vld [vmem:[#allocation7 + $0xd8] sm:$0xff]  ;;  %v235_v22 = vld [vmem:[#allocation7 + $0x1d0] sm:$0xff] }
  0x30   :  { %331 = vmatpush.msra.mxu1 %v206_v13  ;;  %312 = vmatpush.msra.mxu0 %v189_v12  ;;  %v203_v23 = vld [vmem:[#allocation7 + $0xd0] sm:$0xff]  ;;  %v218_v24 = vld [vmem:[#allocation7 + $0x148] sm:$0xff]  ;;  %v217_v28 = vld [vmem:[#allocation7 + $0x140] sm:$0xff] }
  0x31   :  { %372 = vmatpush.msra.mxu3 %v237_v14  ;;  %353 = vmatpush.msra.mxu2 %v220_v16  ;;  %v186_v25 = vld [vmem:[#allocation7 + $0x48] sm:$0xff]  ;;  %v185_v29 = vld [vmem:[#allocation7 + $0x40] sm:$0xff]  ;;  %v216_v32 = vld [vmem:[#allocation7 + $0x138] sm:$0xff] }
  0x32   :  { %332 = vmatpush.msra.mxu1 %v205_v15  ;;  %313 = vmatpush.msra.mxu0 %v188_v17  ;;  %v234_v26 = vld [vmem:[#allocation7 + $0x1c8] sm:$0xff]  ;;  %v233_v30 = vld [vmem:[#allocation7 + $0x1c0] sm:$0xff]  ;;  %v184_v33 = vld [vmem:[#allocation7 + $0x38] sm:$0xff] }
  0x33   :  { %373 = vmatpush.msra.mxu3 %v236_v18  ;;  %354 = vmatpush.msra.mxu2 %v219_v20  ;;  %v202_v27 = vld [vmem:[#allocation7 + $0xc8] sm:$0xff]  ;;  %v201_v31 = vld [vmem:[#allocation7 + $0xc0] sm:$0xff]  ;;  %v232_v34 = vld [vmem:[#allocation7 + $0x1b8] sm:$0xff] }
  0x34   :  { %333 = vmatpush.msra.mxu1 %v204_v19  ;;  %314 = vmatpush.msra.mxu0 %v187_v21  ;;  %v200_v35 = vld [vmem:[#allocation7 + $0xb8] sm:$0xff]  ;;  %v215_v36 = vld [vmem:[#allocation7 + $0x130] sm:$0xff]  ;;  %v214_v40 = vld [vmem:[#allocation7 + $0x128] sm:$0xff] }
  0x35   :  { %374 = vmatpush.msra.mxu3 %v235_v22  ;;  %355 = vmatpush.msra.mxu2 %v218_v24  ;;  %v183_v37 = vld [vmem:[#allocation7 + $0x30] sm:$0xff]  ;;  %v182_v41 = vld [vmem:[#allocation7 + $0x28] sm:$0xff]  ;;  %v213_v44 = vld [vmem:[#allocation7 + $0x120] sm:$0xff] }
  0x36   :  { %334 = vmatpush.msra.mxu1 %v203_v23  ;;  %315 = vmatpush.msra.mxu0 %v186_v25  ;;  %v231_v38 = vld [vmem:[#allocation7 + $0x1b0] sm:$0xff]  ;;  %v230_v42 = vld [vmem:[#allocation7 + $0x1a8] sm:$0xff]  ;;  %v181_v45 = vld [vmem:[#allocation7 + $0x20] sm:$0xff] }
  0x37   :  { %375 = vmatpush.msra.mxu3 %v234_v26  ;;  %356 = vmatpush.msra.mxu2 %v217_v28  ;;  %v199_v39 = vld [vmem:[#allocation7 + $0xb0] sm:$0xff]  ;;  %v198_v43 = vld [vmem:[#allocation7 + $0xa8] sm:$0xff]  ;;  %v229_v46 = vld [vmem:[#allocation7 + $0x1a0] sm:$0xff] }
  0x38   :  { %335 = vmatpush.msra.mxu1 %v202_v27  ;;  %316 = vmatpush.msra.mxu0 %v185_v29  ;;  %v197_v47 = vld [vmem:[#allocation7 + $0xa0] sm:$0xff]  ;;  %v212_v48 = vld [vmem:[#allocation7 + $0x118] sm:$0xff]  ;;  %v211_v52 = vld [vmem:[#allocation7 + $0x110] sm:$0xff] }
  0x39   :  { %376 = vmatpush.msra.mxu3 %v233_v30  ;;  %357 = vmatpush.msra.mxu2 %v216_v32  ;;  %v180_v49 = vld [vmem:[#allocation7 + $0x18] sm:$0xff]  ;;  %v179_v53 = vld [vmem:[#allocation7 + $0x10] sm:$0xff]  ;;  %v210_v56 = vld [vmem:[#allocation7 + $0x108] sm:$0xff] }
  0x3a   :  { %336 = vmatpush.msra.mxu1 %v201_v31  ;;  %317 = vmatpush.msra.mxu0 %v184_v33  ;;  %v228_v50 = vld [vmem:[#allocation7 + $0x198] sm:$0xff]  ;;  %v227_v54 = vld [vmem:[#allocation7 + $0x190] sm:$0xff]  ;;  %v178_v57 = vld [vmem:[#allocation7 + $0x8] sm:$0xff] }
  0x3b   :  { %377 = vmatpush.msra.mxu3 %v232_v34  ;;  %358 = vmatpush.msra.mxu2 %v215_v36  ;;  %v196_v51 = vld [vmem:[#allocation7 + $0x98] sm:$0xff]  ;;  %v195_v55 = vld [vmem:[#allocation7 + $0x90] sm:$0xff]  ;;  %v226_v58 = vld [vmem:[#allocation7 + $0x188] sm:$0xff] }
  0x3c   :  { %337 = vmatpush.msra.mxu1 %v200_v35  ;;  %318 = vmatpush.msra.mxu0 %v183_v37  ;;  %v194_v59 = vld [vmem:[#allocation7 + $0x88] sm:$0xff]  ;;  %v209_v60 = vld [vmem:[#allocation7 + $0x100] sm:$0xff]  ;;  %v288_v62 = vld [vmem:[#allocation7 + $0x378] sm:$0xff] }
  0x3d   :  { %378 = vmatpush.msra.mxu3 %v231_v38  ;;  %359 = vmatpush.msra.mxu2 %v214_v40  ;;  %v177_v61 = vld [vmem:[#allocation7] sm:$0xff]  ;;  %v256_v0 = vld [vmem:[#allocation7 + $0x278] sm:$0xff]  ;;  %v287_v2 = vld [vmem:[#allocation7 + $0x370] sm:$0xff] }
  0x3e   :  { %338 = vmatpush.msra.mxu1 %v199_v39  ;;  %319 = vmatpush.msra.mxu0 %v182_v41  ;;  %v225_v63 = vld [vmem:[#allocation7 + $0x180] sm:$0xff]  ;;  %v304_v1 = vld [vmem:[#allocation7 + $0x3f8] sm:$0xff]  ;;  %v255_v4 = vld [vmem:[#allocation7 + $0x270] sm:$0xff] }
  0x3f   :  { %379 = vmatpush.msra.mxu3 %v230_v42  ;;  %360 = vmatpush.msra.mxu2 %v213_v44  ;;  %v193_v3 = vld [vmem:[#allocation7 + $0x80] sm:$0xff]  ;;  %v272_v5 = vld [vmem:[#allocation7 + $0x2f8] sm:$0xff]  ;;  %v286_v6 = vld [vmem:[#allocation7 + $0x368] sm:$0xff] }
  0x40   :  { %339 = vmatpush.msra.mxu1 %v198_v43  ;;  %320 = vmatpush.msra.mxu0 %v181_v45  ;;  %v303_v7 = vld [vmem:[#allocation7 + $0x3f0] sm:$0xff]  ;;  %v254_v8 = vld [vmem:[#allocation7 + $0x268] sm:$0xff]  ;;  %v285_v10 = vld [vmem:[#allocation7 + $0x360] sm:$0xff] }
  0x41   :  { %380 = vmatpush.msra.mxu3 %v229_v46  ;;  %361 = vmatpush.msra.mxu2 %v212_v48  ;;  %v271_v9 = vld [vmem:[#allocation7 + $0x2f0] sm:$0xff]  ;;  %v302_v11 = vld [vmem:[#allocation7 + $0x3e8] sm:$0xff]  ;;  %v253_v12 = vld [vmem:[#allocation7 + $0x260] sm:$0xff] }
  0x42   :  { %340 = vmatpush.msra.mxu1 %v197_v47  ;;  %321 = vmatpush.msra.mxu0 %v180_v49  ;;  %v270_v13 = vld [vmem:[#allocation7 + $0x2e8] sm:$0xff]  ;;  %v284_v14 = vld [vmem:[#allocation7 + $0x358] sm:$0xff]  ;;  %v301_v15 = vld [vmem:[#allocation7 + $0x3e0] sm:$0xff] }
  0x43   :  { %381 = vmatpush.msra.mxu3 %v228_v50  ;;  %362 = vmatpush.msra.mxu2 %v211_v52  ;;  %v252_v16 = vld [vmem:[#allocation7 + $0x258] sm:$0xff]  ;;  %v269_v17 = vld [vmem:[#allocation7 + $0x2e0] sm:$0xff]  ;;  %v283_v18 = vld [vmem:[#allocation7 + $0x350] sm:$0xff] }
  0x44   :  { %341 = vmatpush.msra.mxu1 %v196_v51  ;;  %322 = vmatpush.msra.mxu0 %v179_v53  ;;  %v300_v19 = vld [vmem:[#allocation7 + $0x3d8] sm:$0xff]  ;;  %v251_v20 = vld [vmem:[#allocation7 + $0x250] sm:$0xff]  ;;  %v282_v22 = vld [vmem:[#allocation7 + $0x348] sm:$0xff] }
  0x45   :  { %382 = vmatpush.msra.mxu3 %v227_v54  ;;  %363 = vmatpush.msra.mxu2 %v210_v56  ;;  %v268_v21 = vld [vmem:[#allocation7 + $0x2d8] sm:$0xff]  ;;  %v299_v23 = vld [vmem:[#allocation7 + $0x3d0] sm:$0xff]  ;;  %v250_v24 = vld [vmem:[#allocation7 + $0x248] sm:$0xff] }
  0x46   :  { %342 = vmatpush.msra.mxu1 %v195_v55  ;;  %323 = vmatpush.msra.mxu0 %v178_v57  ;;  %v267_v25 = vld [vmem:[#allocation7 + $0x2d0] sm:$0xff]  ;;  %v281_v26 = vld [vmem:[#allocation7 + $0x340] sm:$0xff]  ;;  %v298_v27 = vld [vmem:[#allocation7 + $0x3c8] sm:$0xff] }
  0x47   :  { %383 = vmatpush.msra.mxu3 %v226_v58  ;;  %364 = vmatpush.msra.mxu2 %v209_v60  ;;  %v249_v28 = vld [vmem:[#allocation7 + $0x240] sm:$0xff]  ;;  %v266_v29 = vld [vmem:[#allocation7 + $0x2c8] sm:$0xff]  ;;  %v280_v30 = vld [vmem:[#allocation7 + $0x338] sm:$0xff] }
  0x48   :  { %343 = vmatpush.msra.mxu1 %v194_v59  ;;  %324 = vmatpush.msra.mxu0 %v177_v61  ;;  %v297_v31 = vld [vmem:[#allocation7 + $0x3c0] sm:$0xff]  ;;  %v248_v32 = vld [vmem:[#allocation7 + $0x238] sm:$0xff]  ;;  %v279_v34 = vld [vmem:[#allocation7 + $0x330] sm:$0xff] }
  0x49   :  { %429 = vmatpush.msrb.mxu2 %v288_v62  ;;  %384 = vmatpush.msra.mxu3 %v225_v63  ;;  %v265_v33 = vld [vmem:[#allocation7 + $0x2c0] sm:$0xff]  ;;  %v296_v35 = vld [vmem:[#allocation7 + $0x3b8] sm:$0xff]  ;;  %v247_v36 = vld [vmem:[#allocation7 + $0x230] sm:$0xff] }
  0x4a   :  { %389 = vmatpush.msrb.mxu0 %v256_v0  ;;  %344 = vmatpush.msra.mxu1 %v193_v3  ;;  %v264_v37 = vld [vmem:[#allocation7 + $0x2b8] sm:$0xff]  ;;  %v278_v38 = vld [vmem:[#allocation7 + $0x328] sm:$0xff]  ;;  %v295_v39 = vld [vmem:[#allocation7 + $0x3b0] sm:$0xff] }
  0x4b   :  { %449 = vmatpush.msrb.mxu3 %v304_v1  ;;  %430 = vmatpush.msrb.mxu2 %v287_v2  ;;  %v246_v40 = vld [vmem:[#allocation7 + $0x228] sm:$0xff]  ;;  %v263_v41 = vld [vmem:[#allocation7 + $0x2b0] sm:$0xff]  ;;  %v277_v42 = vld [vmem:[#allocation7 + $0x320] sm:$0xff] }
  0x4c   :  { %390 = vmatpush.msrb.mxu0 %v255_v4  ;;  %409 = vmatpush.msrb.mxu1 %v272_v5  ;;  %v294_v43 = vld [vmem:[#allocation7 + $0x3a8] sm:$0xff]  ;;  %v245_v45 = vld [vmem:[#allocation7 + $0x220] sm:$0xff]  ;;  %v276_v47 = vld [vmem:[#allocation7 + $0x318] sm:$0xff] }
  0x4d   :  { %431 = vmatpush.msrb.mxu2 %v286_v6  ;;  %450 = vmatpush.msrb.mxu3 %v303_v7  ;;  %v171_v44 = vld [vmem:[#allocation2 + $0x10] sm:$0xff]  ;;  %v293_v48 = vld [vmem:[#allocation7 + $0x3a0] sm:$0xff]  ;;  %v169_v49 = vld [vmem:[#allocation2] sm:$0xff] }
  0x4e   :  { %391 = vmatpush.msrb.mxu0 %v254_v8  ;;  %410 = vmatpush.msrb.mxu1 %v271_v9  ;;  %v262_v46 = vld [vmem:[#allocation7 + $0x2a8] sm:$0xff]  ;;  %v172_v50 = vld [vmem:[#allocation2 + $0x18] sm:$0xff]  ;;  %v244_v51 = vld [vmem:[#allocation7 + $0x218] sm:$0xff] }
  0x4f   :  { %432 = vmatpush.msrb.mxu2 %v285_v10  ;;  %451 = vmatpush.msrb.mxu3 %v302_v11  ;;  %v261_v52 = vld [vmem:[#allocation7 + $0x2a0] sm:$0xff]  ;;  %v275_v53 = vld [vmem:[#allocation7 + $0x310] sm:$0xff]  ;;  %v292_v54 = vld [vmem:[#allocation7 + $0x398] sm:$0xff] }
  0x50   :  { %392 = vmatpush.msrb.mxu0 %v253_v12  ;;  %411 = vmatpush.msrb.mxu1 %v270_v13  ;;  %v170_v55 = vld [vmem:[#allocation2 + $0x8] sm:$0xff]  ;;  %v243_v56 = vld [vmem:[#allocation7 + $0x210] sm:$0xff]  ;;  %v260_v57 = vld [vmem:[#allocation7 + $0x298] sm:$0xff] }
  0x51   :  { %433 = vmatpush.msrb.mxu2 %v284_v14  ;;  %452 = vmatpush.msrb.mxu3 %v301_v15  ;;  %v274_v58 = vld [vmem:[#allocation7 + $0x308] sm:$0xff]  ;;  %v291_v59 = vld [vmem:[#allocation7 + $0x390] sm:$0xff]  ;;  %v273_v62 = vld [vmem:[#allocation7 + $0x300] sm:$0xff] }
  0x52   :  { %393 = vmatpush.msrb.mxu0 %v252_v16  ;;  %412 = vmatpush.msrb.mxu1 %v269_v17  ;;  %v242_v60 = vld [vmem:[#allocation7 + $0x208] sm:$0xff]  ;;  %v259_v61 = vld [vmem:[#allocation7 + $0x290] sm:$0xff]  ;;  %v241_v1 = vld [vmem:[#allocation7 + $0x200] sm:$0xff] }
  0x53   :  { %434 = vmatpush.msrb.mxu2 %v283_v18  ;;  %453 = vmatpush.msrb.mxu3 %v300_v19  ;;  %v290_v63 = vld [vmem:[#allocation7 + $0x388] sm:$0xff]  ;;  %v289_v3 = vld [vmem:[#allocation7 + $0x380] sm:$0xff]  ;;  %v173_v4 = vld [vmem:[#allocation2 + $0x20] sm:$0xff] }
  0x54   :  { %394 = vmatpush.msrb.mxu0 %v251_v20  ;;  %413 = vmatpush.msrb.mxu1 %v268_v21  ;;  %v175_v0 = vld [vmem:[#allocation2 + $0x30] sm:$0xff]  ;;  %v176_v5 = vld [vmem:[#allocation2 + $0x38] sm:$0xff]  ;;  %v257_v6 = vld [vmem:[#allocation7 + $0x280] sm:$0xff] }
  0x55   :  { %435 = vmatpush.msrb.mxu2 %v282_v22  ;;  %454 = vmatpush.msrb.mxu3 %v299_v23  ;;  %v258_v2 = vld [vmem:[#allocation7 + $0x288] sm:$0xff]  ;;  %v500_v7 = vld [vmem:[#allocation10 + $0xf0] sm:$0xff]  ;;  %v174_v8 = vld [vmem:[#allocation2 + $0x28] sm:$0xff] }
  0x56   :  { %395 = vmatpush.msrb.mxu0 %v250_v24  ;;  %414 = vmatpush.msrb.mxu1 %v267_v25  ;;  %v501_v9 = vld [vmem:[#allocation10 + $0xf8] sm:$0xff]  ;;  %v498_v10 = vld [vmem:[#allocation10 + $0xe0] sm:$0xff]  ;;  %v499_v11 = vld [vmem:[#allocation10 + $0xe8] sm:$0xff] }
  0x57   :  { %436 = vmatpush.msrb.mxu2 %v281_v26  ;;  %455 = vmatpush.msrb.mxu3 %v298_v27  ;;  %v496_v12 = vld [vmem:[#allocation10 + $0xd0] sm:$0xff]  ;;  %v497_v13 = vld [vmem:[#allocation10 + $0xd8] sm:$0xff]  ;;  %v494_v14 = vld [vmem:[#allocation10 + $0xc0] sm:$0xff] }
  0x58   :  { %396 = vmatpush.msrb.mxu0 %v249_v28  ;;  %415 = vmatpush.msrb.mxu1 %v266_v29  ;;  %v495_v15 = vld [vmem:[#allocation10 + $0xc8] sm:$0xff]  ;;  %v492_v16 = vld [vmem:[#allocation10 + $0xb0] sm:$0xff]  ;;  %v493_v17 = vld [vmem:[#allocation10 + $0xb8] sm:$0xff] }
  0x59   :  { %437 = vmatpush.msrb.mxu2 %v280_v30  ;;  %456 = vmatpush.msrb.mxu3 %v297_v31  ;;  %v490_v18 = vld [vmem:[#allocation10 + $0xa0] sm:$0xff]  ;;  %v491_v19 = vld [vmem:[#allocation10 + $0xa8] sm:$0xff]  ;;  %v488_v20 = vld [vmem:[#allocation10 + $0x90] sm:$0xff] }
  0x5a   :  { %397 = vmatpush.msrb.mxu0 %v248_v32  ;;  %416 = vmatpush.msrb.mxu1 %v265_v33  ;;  %v489_v21 = vld [vmem:[#allocation10 + $0x98] sm:$0xff]  ;;  %v486_v22 = vld [vmem:[#allocation10 + $0x80] sm:$0xff]  ;;  %v487_v23 = vld [vmem:[#allocation10 + $0x88] sm:$0xff] }
  0x5b   :  { %438 = vmatpush.msrb.mxu2 %v279_v34  ;;  %457 = vmatpush.msrb.mxu3 %v296_v35  ;;  %v484_v24 = vld [vmem:[#allocation10 + $0x70] sm:$0xff]  ;;  %v485_v25 = vld [vmem:[#allocation10 + $0x78] sm:$0xff]  ;;  %v482_v26 = vld [vmem:[#allocation10 + $0x60] sm:$0xff] }
  0x5c   :  { %398 = vmatpush.msrb.mxu0 %v247_v36  ;;  %417 = vmatpush.msrb.mxu1 %v264_v37  ;;  %v483_v27 = vld [vmem:[#allocation10 + $0x68] sm:$0xff]  ;;  %v480_v28 = vld [vmem:[#allocation10 + $0x50] sm:$0xff]  ;;  %v481_v29 = vld [vmem:[#allocation10 + $0x58] sm:$0xff] }
  0x5d   :  { %439 = vmatpush.msrb.mxu2 %v278_v38  ;;  %458 = vmatpush.msrb.mxu3 %v295_v39  ;;  %v478_v30 = vld [vmem:[#allocation10 + $0x40] sm:$0xff]  ;;  %v479_v31 = vld [vmem:[#allocation10 + $0x48] sm:$0xff]  ;;  %v476_v32 = vld [vmem:[#allocation10 + $0x30] sm:$0xff] }
  0x5e   :  { %399 = vmatpush.msrb.mxu0 %v246_v40  ;;  %418 = vmatpush.msrb.mxu1 %v263_v41  ;;  %v477_v33 = vld [vmem:[#allocation10 + $0x38] sm:$0xff]  ;;  %v474_v34 = vld [vmem:[#allocation10 + $0x20] sm:$0xff]  ;;  %v475_v35 = vld [vmem:[#allocation10 + $0x28] sm:$0xff] }
  0x5f   :  { %440 = vmatpush.msrb.mxu2 %v277_v42  ;;  %459 = vmatpush.msrb.mxu3 %v294_v43  ;;  %v472_v36 = vld [vmem:[#allocation10 + $0x10] sm:$0xff]  ;;  %v473_v37 = vld [vmem:[#allocation10 + $0x18] sm:$0xff]  ;;  %v470_v38 = vld [vmem:[#allocation10] sm:$0xff] }
  0x60   :  { %365 = vmatmul.f32.vlgmr.msra.gmra.mxu2 %v171_v44  ;;  %400 = vmatpush.msrb.mxu0 %v245_v45  ;;  %v471_v39 = vld [vmem:[#allocation10 + $0x8] sm:$0xff]  ;;  %v570_v40 = vld [vmem:[#allocation13 + $0x78] sm:$0xff]  ;;  %v569_v41 = vld [vmem:[#allocation13 + $0x70] sm:$0xff] }
  0x61   :  { %419 = vmatpush.msrb.mxu1 %v262_v46  ;;  %441 = vmatpush.msrb.mxu2 %v276_v47  ;;  %v568_v42 = vld [vmem:[#allocation13 + $0x68] sm:$0xff]  ;;  %v567_v43 = vld [vmem:[#allocation13 + $0x60] sm:$0xff]  ;;  %v566_v44 = vld [vmem:[#allocation13 + $0x58] sm:$0xff] }
  0x62   :  { %460 = vmatpush.msrb.mxu3 %v293_v48  ;;  %325 = vmatmul.f32.vlgmr.msra.gmra.mxu0 %v169_v49  ;;  %v1124_v45 = vld [vmem:[#allocation8] ss:$0 sm:$0xff]  ;;  %v565_v46 = vld [vmem:[#allocation13 + $0x50] sm:$0xff]  ;;  %v564_v47 = vld [vmem:[#allocation13 + $0x48] sm:$0xff] }
  0x63   :  { %385 = vmatmul.f32.vlgmr.msra.gmra.mxu3 %v172_v50  ;;  %401 = vmatpush.msrb.mxu0 %v244_v51 }
  0x64   :  { %420 = vmatpush.msrb.mxu1 %v261_v52  ;;  %442 = vmatpush.msrb.mxu2 %v275_v53 }
  0x65   :  { %461 = vmatpush.msrb.mxu3 %v292_v54  ;;  %345 = vmatmul.f32.vlgmr.msra.gmra.mxu1 %v170_v55 }
  0x66   :  { %402 = vmatpush.msrb.mxu0 %v243_v56  ;;  %421 = vmatpush.msrb.mxu1 %v260_v57 }
  0x67   :  { %443 = vmatpush.msrb.mxu2 %v274_v58  ;;  %462 = vmatpush.msrb.mxu3 %v291_v59 }
  0x68   :  { %403 = vmatpush.msrb.mxu0 %v242_v60  ;;  %422 = vmatpush.msrb.mxu1 %v259_v61 }
  0x69   :  { %444 = vmatpush.msrb.mxu2 %v273_v62  ;;  %463 = vmatpush.msrb.mxu3 %v290_v63 }
  0x6a   :  { %445 = vmatmul.f32.vlgmr.msrb.gmra.mxu2 %v175_v0  ;;  %404 = vmatpush.msrb.mxu0 %v241_v1  ;;  %v563_v1 = vld [vmem:[#allocation13 + $0x40] sm:$0xff] }
  0x6b   :  { %423 = vmatpush.msrb.mxu1 %v258_v2  ;;  %464 = vmatpush.msrb.mxu3 %v289_v3  ;;  %v562_v2 = vld [vmem:[#allocation13 + $0x38] sm:$0xff]  ;;  %v561_v3 = vld [vmem:[#allocation13 + $0x30] sm:$0xff] }
  0x6c   :  { %405 = vmatmul.f32.vlgmr.msrb.gmra.mxu0 %v173_v4  ;;  %465 = vmatmul.f32.vlgmr.msrb.gmra.mxu3 %v176_v5  ;;  %v560_v4 = vld [vmem:[#allocation13 + $0x28] sm:$0xff]  ;;  %v559_v5 = vld [vmem:[#allocation13 + $0x20] sm:$0xff] }
  0x6d   :  { %424 = vmatpush.msrb.mxu1 %v257_v6  ;;  %508 = vmatpush.msra.mxu0 %v500_v7  ;;  %v558_v6 = vld [vmem:[#allocation13 + $0x18] sm:$0xff]  ;;  %v557_v7 = vld [vmem:[#allocation13 + $0x10] sm:$0xff] }
  0x6e   :  { %425 = vmatmul.f32.vlgmr.msrb.gmra.mxu1 %v174_v8  ;;  %575 = vmatpush.msra.mxu2 %v570_v40  ;;  %v556_v8 = vld [vmem:[#allocation13 + $0x8] sm:$0xff] }
  0x6f   :  { %528 = vmatpush.msra.mxu1 %v501_v9  ;;  %509 = vmatpush.msra.mxu0 %v498_v10  ;;  %v555_v9 = vld [vmem:[#allocation13] sm:$0xff] }
  0x70   :  { %576 = vmatpush.msra.mxu2 %v569_v41  ;;  %v716_v10 = vld [vmem:[#allocation16 + $0x3c0] sm:$0xff]  ;;  %v661_v41 = vld [vmem:[#allocation16 + $0x208] sm:$0xff] }
  0x71   :  { %529 = vmatpush.msra.mxu1 %v499_v11  ;;  %510 = vmatpush.msra.mxu0 %v496_v12  ;;  %v717_v11 = vld [vmem:[#allocation16 + $0x3c8] sm:$0xff]  ;;  %v718_v12 = vld [vmem:[#allocation16 + $0x3d0] sm:$0xff]  ;;  %v660_v40 = vld [vmem:[#allocation16 + $0x200] sm:$0xff] }
  0x72   :  { %577 = vmatpush.msra.mxu2 %v568_v42  ;;  %742 = vmatpush.msra.mxu3 %v716_v10  ;;  %v662_v42 = vld [vmem:[#allocation16 + $0x210] sm:$0xff]  ;;  %v615_v10 = vld [vmem:[#allocation16 + $0x98] sm:$0xff] }
  0x73   :  { %530 = vmatpush.msra.mxu1 %v497_v13  ;;  %511 = vmatpush.msra.mxu0 %v494_v14  ;;  %v719_v13 = vld [vmem:[#allocation16 + $0x3d8] sm:$0xff]  ;;  %v708_v14 = vld [vmem:[#allocation16 + $0x380] sm:$0xff] }
  0x74   :  { %578 = vmatpush.msra.mxu2 %v567_v43  ;;  %743 = vmatpush.msra.mxu3 %v708_v14  ;;  %v663_v43 = vld [vmem:[#allocation16 + $0x218] sm:$0xff]  ;;  %v606_v14 = vld [vmem:[#allocation16 + $0x50] sm:$0xff] }
  0x75   :  { %531 = vmatpush.msra.mxu1 %v495_v15  ;;  %512 = vmatpush.msra.mxu0 %v492_v16  ;;  %v709_v15 = vld [vmem:[#allocation16 + $0x388] sm:$0xff]  ;;  %v710_v16 = vld [vmem:[#allocation16 + $0x390] sm:$0xff] }
  0x76   :  { %579 = vmatpush.msra.mxu2 %v566_v44 }
  0x77   :  { %532 = vmatpush.msra.mxu1 %v493_v17  ;;  %513 = vmatpush.msra.mxu0 %v490_v18  ;;  %v711_v17 = vld [vmem:[#allocation16 + $0x398] sm:$0xff]  ;;  %v700_v18 = vld [vmem:[#allocation16 + $0x340] sm:$0xff] }
  0x78   :  { %580 = vmatpush.msra.mxu2 %v565_v46  ;;  %744 = vmatpush.msra.mxu3 %v700_v18  ;;  %v653_v46 = vld [vmem:[#allocation16 + $0x1c8] sm:$0xff]  ;;  %v596_v18 = vld [vmem:[#allocation16] sm:$0xff] }
  0x79   :  { %533 = vmatpush.msra.mxu1 %v491_v19  ;;  %514 = vmatpush.msra.mxu0 %v488_v20  ;;  %v701_v19 = vld [vmem:[#allocation16 + $0x348] sm:$0xff]  ;;  %v702_v20 = vld [vmem:[#allocation16 + $0x350] sm:$0xff] }
  0x7a   :  { %581 = vmatpush.msra.mxu2 %v564_v47 }
  0x7b   :  { %534 = vmatpush.msra.mxu1 %v489_v21  ;;  %515 = vmatpush.msra.mxu0 %v486_v22  ;;  %v703_v21 = vld [vmem:[#allocation16 + $0x358] sm:$0xff]  ;;  %v692_v22 = vld [vmem:[#allocation16 + $0x300] sm:$0xff] }
  0x7c   :  { %582 = vmatpush.msra.mxu2 %v563_v1  ;;  %745 = vmatpush.msra.mxu3 %v692_v22  ;;  %v621_v1 = vld [vmem:[#allocation16 + $0xc8] sm:$0xff]  ;;  %v599_v22 = vld [vmem:[#allocation16 + $0x18] sm:$0xff] }
  0x7d   :  { %535 = vmatpush.msra.mxu1 %v487_v23  ;;  %516 = vmatpush.msra.mxu0 %v484_v24  ;;  %v693_v23 = vld [vmem:[#allocation16 + $0x308] sm:$0xff]  ;;  %v694_v24 = vld [vmem:[#allocation16 + $0x310] sm:$0xff] }
  0x7e   :  { %583 = vmatpush.msra.mxu2 %v562_v2  ;;  %v622_v2 = vld [vmem:[#allocation16 + $0xd0] sm:$0xff] }
  0x7f   :  { %536 = vmatpush.msra.mxu1 %v485_v25  ;;  %517 = vmatpush.msra.mxu0 %v482_v26  ;;  %v695_v25 = vld [vmem:[#allocation16 + $0x318] sm:$0xff]  ;;  %v684_v26 = vld [vmem:[#allocation16 + $0x2c0] sm:$0xff] }
  0x80   :  { %584 = vmatpush.msra.mxu2 %v561_v3  ;;  %746 = vmatpush.msra.mxu3 %v684_v26  ;;  %v623_v3 = vld [vmem:[#allocation16 + $0xd8] sm:$0xff] }
  0x81   :  { %537 = vmatpush.msra.mxu1 %v483_v27  ;;  %518 = vmatpush.msra.mxu0 %v480_v28  ;;  %v685_v27 = vld [vmem:[#allocation16 + $0x2c8] sm:$0xff]  ;;  %v686_v28 = vld [vmem:[#allocation16 + $0x2d0] sm:$0xff]  ;;  %v723_v26 = vld [vmem:[#allocation16 + $0x3f8] sm:$0xff] }
  0x82   :  { %585 = vmatpush.msra.mxu2 %v560_v4 }
  0x83   :  { %538 = vmatpush.msra.mxu1 %v481_v29  ;;  %519 = vmatpush.msra.mxu0 %v478_v30  ;;  %v687_v29 = vld [vmem:[#allocation16 + $0x2d8] sm:$0xff] }
  0x84   :  { %586 = vmatpush.msra.mxu2 %v559_v5  ;;  %v1542_v30 = vld [vmem:[#allocation11] sm:$0x3]  ;;  %v612_v5 = vld [vmem:[#allocation16 + $0x80] sm:$0xff] }
  0x85   :  { %539 = vmatpush.msra.mxu1 %v479_v31  ;;  %520 = vmatpush.msra.mxu0 %v476_v32  ;;  %v676_v31 = vld [vmem:[#allocation16 + $0x280] sm:$0xff]  ;;  %v677_v32 = vld [vmem:[#allocation16 + $0x288] sm:$0xff]  ;;  %v504_v4 = vperm.slane %v1542_v30, 0 }
  0x86   :  { %587 = vmatpush.msra.mxu2 %v558_v6  ;;  %747 = vmatpush.msra.mxu3 %v676_v31  ;;  %v613_v6 = vld [vmem:[#allocation16 + $0x88] sm:$0xff]  ;;  %v704_v31 = vld [vmem:[#allocation16 + $0x360] sm:$0xff] }
  0x87   :  { %540 = vmatpush.msra.mxu1 %v477_v33  ;;  %521 = vmatpush.msra.mxu0 %v474_v34  ;;  %v678_v33 = vld [vmem:[#allocation16 + $0x290] sm:$0xff]  ;;  %v679_v34 = vld [vmem:[#allocation16 + $0x298] sm:$0xff] }
  0x88   :  { %588 = vmatpush.msra.mxu2 %v557_v7 }
  0x89   :  { %541 = vmatpush.msra.mxu1 %v475_v35  ;;  %522 = vmatpush.msra.mxu0 %v472_v36  ;;  %v668_v35 = vld [vmem:[#allocation16 + $0x240] sm:$0xff]  ;;  %v669_v36 = vld [vmem:[#allocation16 + $0x248] sm:$0xff] }
  0x8a   :  { %589 = vmatpush.msra.mxu2 %v556_v8  ;;  %748 = vmatpush.msra.mxu3 %v668_v35  ;;  %v551_v8 = vld [vmem:[#allocation5] sm:$0xff]  ;;  %v696_v35 = vld [vmem:[#allocation16 + $0x320] sm:$0xff] }
  0x8b   :  { %542 = vmatpush.msra.mxu1 %v473_v37  ;;  %523 = vmatpush.msra.mxu0 %v470_v38  ;;  %v505_v37 = vperm.slane %v1542_v30, 1  ;;  %v670_v38 = vld [vmem:[#allocation16 + $0x250] sm:$0xff]  ;;  %v715_v30 = vld [vmem:[#allocation16 + $0x3b8] sm:$0xff] }
  0x8c   :  { %590 = vmatpush.msra.mxu2 %v555_v9  ;;  %749 = vmatpush.msra.mxu3 %v660_v40  ;;  %v614_v9 = vld [vmem:[#allocation16 + $0x90] sm:$0xff]  ;;  %v689_v40 = vld [vmem:[#allocation16 + $0x2e8] sm:$0xff] }
  0x8d   :  { %543 = vmatpush.msra.mxu1 %v471_v39  ;;  %762 = vmatpush.msrb.mxu0 %v717_v11  ;;  %v671_v39 = vld [vmem:[#allocation16 + $0x258] sm:$0xff]  ;;  %v604_v11 = vld [vmem:[#allocation16 + $0x40] sm:$0xff] }
  0x8e   :  { %802 = vmatpush.msrb.mxu2 %v719_v13 }
  0x8f   :  { %782 = vmatpush.msrb.mxu1 %v718_v12  ;;  %763 = vmatpush.msrb.mxu0 %v709_v15  ;;  %v605_v12 = vld [vmem:[#allocation16 + $0x48] sm:$0xff]  ;;  %v607_v15 = vld [vmem:[#allocation16 + $0x58] sm:$0xff] }
  0x90   :  { %803 = vmatpush.msrb.mxu2 %v711_v17 }
  0x91   :  { %783 = vmatpush.msrb.mxu1 %v710_v16  ;;  %764 = vmatpush.msrb.mxu0 %v701_v19  ;;  %v597_v19 = vld [vmem:[#allocation16 + $0x8] sm:$0xff] }
  0x92   :  { %804 = vmatpush.msrb.mxu2 %v703_v21 }
  0x93   :  { %784 = vmatpush.msrb.mxu1 %v702_v20  ;;  %765 = vmatpush.msrb.mxu0 %v693_v23  ;;  %v598_v20 = vld [vmem:[#allocation16 + $0x10] sm:$0xff]  ;;  %v720_v23 = vld [vmem:[#allocation16 + $0x3e0] sm:$0xff] }
  0x94   :  { %805 = vmatpush.msrb.mxu2 %v695_v25  ;;  %v722_v25 = vld [vmem:[#allocation16 + $0x3f0] sm:$0xff] }
  0x95   :  { %785 = vmatpush.msrb.mxu1 %v694_v24  ;;  %766 = vmatpush.msrb.mxu0 %v685_v27  ;;  %v721_v24 = vld [vmem:[#allocation16 + $0x3e8] sm:$0xff]  ;;  %v712_v27 = vld [vmem:[#allocation16 + $0x3a0] sm:$0xff] }
  0x96   :  { %806 = vmatpush.msrb.mxu2 %v687_v29  ;;  %v714_v29 = vld [vmem:[#allocation16 + $0x3b0] sm:$0xff] }
  0x97   :  { %786 = vmatpush.msrb.mxu1 %v686_v28  ;;  %767 = vmatpush.msrb.mxu0 %v677_v32  ;;  %v713_v28 = vld [vmem:[#allocation16 + $0x3a8] sm:$0xff] }
  0x98   :  { %807 = vmatpush.msrb.mxu2 %v679_v34  ;;  %v705_v32 = vld [vmem:[#allocation16 + $0x368] sm:$0xff]  ;;  %v707_v34 = vld [vmem:[#allocation16 + $0x378] sm:$0xff] }
  0x99   :  { %787 = vmatpush.msrb.mxu1 %v678_v33  ;;  %768 = vmatpush.msrb.mxu0 %v669_v36  ;;  %v706_v33 = vld [vmem:[#allocation16 + $0x370] sm:$0xff]  ;;  %v697_v36 = vld [vmem:[#allocation16 + $0x328] sm:$0xff] }
  0x9a   :  { %808 = vmatpush.msrb.mxu2 %v671_v39  ;;  %v688_v39 = vld [vmem:[#allocation16 + $0x2e0] sm:$0xff] }
  0x9b   :  { %788 = vmatpush.msrb.mxu1 %v670_v38  ;;  %769 = vmatpush.msrb.mxu0 %v661_v41  ;;  %v699_v38 = vld [vmem:[#allocation16 + $0x338] sm:$0xff]  ;;  %v690_v41 = vld [vmem:[#allocation16 + $0x2f0] sm:$0xff] }
  0x9c   :  { %809 = vmatpush.msrb.mxu2 %v663_v43  ;;  %v680_v43 = vld [vmem:[#allocation16 + $0x2a0] sm:$0xff] }
  0x9d   :  { %789 = vmatpush.msrb.mxu1 %v662_v42  ;;  %770 = vmatpush.msrb.mxu0 %v653_v46  ;;  %v691_v42 = vld [vmem:[#allocation16 + $0x2f8] sm:$0xff] }
  0x9e   :  { %v683_v46 = vld [vmem:[#allocation16 + $0x2b8] sm:$0xff] }
  0xdf   :  { %v326_v48 = vpop.f32.mrf.mxu0 }
  0xe0   :  { %v327_v49 = vadd.f32 %v1124_v45, %v326_v48  ;;  %v652_v45 = vld [vmem:[#allocation16 + $0x1c0] sm:$0xff]  ;;  %v654_v48 = vld [vmem:[#allocation16 + $0x1d0] sm:$0xff] }
  0xe1   :  { %750 = vmatpush.msra.mxu3 %v652_v45  ;;  %790 = vmatpush.msrb.mxu1 %v654_v48  ;;  %v682_v45 = vld [vmem:[#allocation16 + $0x2b0] sm:$0xff]  ;;  %v673_v48 = vld [vmem:[#allocation16 + $0x268] sm:$0xff] }
  0xe2   :  { %v346_v50 = vpop.f32.mrf.mxu1 }
  0xe3   :  { %v347_v51 = vadd.f32 %v346_v50, %v327_v49  ;;  %v366_v52 = vpop.f32.mrf.mxu2  ;;  %v655_v49 = vld [vmem:[#allocation16 + $0x1d8] sm:$0xff]  ;;  %v644_v50 = vld [vmem:[#allocation16 + $0x180] sm:$0xff] }
  0xe4   :  { %810 = vmatpush.msrb.mxu2 %v655_v49  ;;  %751 = vmatpush.msra.mxu3 %v644_v50  ;;  %v674_v49 = vld [vmem:[#allocation16 + $0x270] sm:$0xff]  ;;  %v675_v50 = vld [vmem:[#allocation16 + $0x278] sm:$0xff] }
  0xe5   :  { %v367_v53 = vadd.f32 %v366_v52, %v347_v51  ;;  %v645_v51 = vld [vmem:[#allocation16 + $0x188] sm:$0xff] }
  0xe6   :  { %v386_v54 = vpop.f32.mrf.mxu3  ;;  %771 = vmatpush.msrb.mxu0 %v645_v51  ;;  %v664_v51 = vld [vmem:[#allocation16 + $0x220] sm:$0xff] }
  0xe7   :  { %v387_v55 = vadd.f32 %v386_v54, %v367_v53  ;;  %v646_v53 = vld [vmem:[#allocation16 + $0x190] sm:$0xff]  ;;  %v647_v54 = vld [vmem:[#allocation16 + $0x198] sm:$0xff] }
  0xe8   :  { %791 = vmatpush.msrb.mxu1 %v646_v53  ;;  %811 = vmatpush.msrb.mxu2 %v647_v54  ;;  %v666_v53 = vld [vmem:[#allocation16 + $0x230] sm:$0xff]  ;;  %v667_v54 = vld [vmem:[#allocation16 + $0x238] sm:$0xff] }
  0xe9   :  { %v406_v56 = vpop.f32.mrf.mxu0 }
  0xea   :  { %v407_v57 = vadd.f32 %v406_v56, %v387_v55  ;;  %v636_v55 = vld [vmem:[#allocation16 + $0x140] sm:$0xff]  ;;  %v637_v56 = vld [vmem:[#allocation16 + $0x148] sm:$0xff] }
  0xeb   :  { %v426_v58 = vpop.f32.mrf.mxu1  ;;  %752 = vmatpush.msra.mxu3 %v636_v55  ;;  %772 = vmatpush.msrb.mxu0 %v637_v56  ;;  %v656_v55 = vld [vmem:[#allocation16 + $0x1e0] sm:$0xff]  ;;  %v657_v56 = vld [vmem:[#allocation16 + $0x1e8] sm:$0xff] }
  0xec   :  { %v427_v59 = vadd.f32 %v426_v58, %v407_v57  ;;  %v638_v58 = vld [vmem:[#allocation16 + $0x150] sm:$0xff] }
  0xed   :  { %v446_v60 = vpop.f32.mrf.mxu2  ;;  %792 = vmatpush.msrb.mxu1 %v638_v58  ;;  %v659_v58 = vld [vmem:[#allocation16 + $0x1f8] sm:$0xff] }
  0xee   :  { %v447_v61 = vadd.f32 %v446_v60, %v427_v59  ;;  %v639_v59 = vld [vmem:[#allocation16 + $0x158] sm:$0xff]  ;;  %v628_v60 = vld [vmem:[#allocation16 + $0x100] sm:$0xff] }
  0xef   :  { %v466_v62 = vpop.f32.mrf.mxu3  ;;  %812 = vmatpush.msrb.mxu2 %v639_v59  ;;  %753 = vmatpush.msra.mxu3 %v628_v60  ;;  %v648_v59 = vld [vmem:[#allocation16 + $0x1a0] sm:$0xff]  ;;  %v649_v60 = vld [vmem:[#allocation16 + $0x1a8] sm:$0xff] }
  0xf0   :  { %v467_v63 = vadd.f32 %v466_v62, %v447_v61  ;;  %v629_v61 = vld [vmem:[#allocation16 + $0x108] sm:$0xff]  ;;  %v630_v62 = vld [vmem:[#allocation16 + $0x110] sm:$0xff] }
  0xf1   :  { %773 = vmatpush.msrb.mxu0 %v629_v61  ;;  %793 = vmatpush.msrb.mxu1 %v630_v62  ;;  %v650_v61 = vld [vmem:[#allocation16 + $0x1b0] sm:$0xff]  ;;  %v651_v62 = vld [vmem:[#allocation16 + $0x1b8] sm:$0xff] }
  0xf2   :  { %v469_v0 = vmax.f32 %v467_v63, 0.0  ;;  %v631_v63 = vld [vmem:[#allocation16 + $0x118] sm:$0xff] }
  0xf3   :  { %813 = vmatpush.msrb.mxu2 %v631_v63  ;;  %774 = vmatpush.msrb.mxu0 %v621_v1  ;;  %v640_v63 = vld [vmem:[#allocation16 + $0x160] sm:$0xff]  ;;  %v642_v1 = vld [vmem:[#allocation16 + $0x170] sm:$0xff] }
  0xf4   :  { %524 = vmatmul.f32.vlgmr.msra.gmra.mxu0 %v469_v0  ;;  %544 = vmatmul.f32.vlgmr.msra.gmra.mxu1 %v469_v0  ;;  %v620_v0 = vld [vmem:[#allocation16 + $0xc0] sm:$0xff] }
  0xf5   :  { %754 = vmatpush.msra.mxu3 %v620_v0  ;;  %794 = vmatpush.msrb.mxu1 %v622_v2  ;;  %v641_v0 = vld [vmem:[#allocation16 + $0x168] sm:$0xff]  ;;  %v643_v2 = vld [vmem:[#allocation16 + $0x178] sm:$0xff] }
  0xf6   :  { %814 = vmatpush.msrb.mxu2 %v623_v3  ;;  %775 = vmatpush.msrb.mxu0 %v613_v6  ;;  %v632_v3 = vld [vmem:[#allocation16 + $0x120] sm:$0xff]  ;;  %v635_v6 = vld [vmem:[#allocation16 + $0x138] sm:$0xff] }
  0xf7   :  { %755 = vmatpush.msra.mxu3 %v612_v5  ;;  %795 = vmatpush.msrb.mxu1 %v614_v9  ;;  %v634_v5 = vld [vmem:[#allocation16 + $0x130] sm:$0xff] }
  0xf8   :  { %815 = vmatpush.msrb.mxu2 %v615_v10  ;;  %776 = vmatpush.msrb.mxu0 %v605_v12  ;;  %v626_v9 = vld [vmem:[#allocation16 + $0xf0] sm:$0xff]  ;;  %v627_v10 = vld [vmem:[#allocation16 + $0xf8] sm:$0xff]  ;;  %v617_v12 = vld [vmem:[#allocation16 + $0xa8] sm:$0xff] }
  0xf9   :  { %756 = vmatpush.msra.mxu3 %v604_v11  ;;  %796 = vmatpush.msrb.mxu1 %v606_v14  ;;  %v616_v11 = vld [vmem:[#allocation16 + $0xa0] sm:$0xff]  ;;  %v619_v14 = vld [vmem:[#allocation16 + $0xb8] sm:$0xff] }
  0xfa   :  { %816 = vmatpush.msrb.mxu2 %v607_v15  ;;  %777 = vmatpush.msrb.mxu0 %v597_v19  ;;  %v608_v15 = vld [vmem:[#allocation16 + $0x60] sm:$0xff] }
  0xfb   :  { %757 = vmatpush.msra.mxu3 %v596_v18  ;;  %797 = vmatpush.msrb.mxu1 %v598_v20  ;;  %v611_v18 = vld [vmem:[#allocation16 + $0x78] sm:$0xff]  ;;  %v600_v19 = vld [vmem:[#allocation16 + $0x20] sm:$0xff]  ;;  %v601_v20 = vld [vmem:[#allocation16 + $0x28] sm:$0xff] }
  0xfc   :  { %817 = vmatpush.msrb.mxu2 %v599_v22  ;;  %842 = vmatpush.msra.mxu0 %v721_v24  ;;  %v603_v22 = vld [vmem:[#allocation16 + $0x38] sm:$0xff] }
  0xfd   :  { %822 = vmatpush.msrb.mxu3 %v720_v23  ;;  %862 = vmatpush.msra.mxu1 %v722_v25  ;;  %v1125_v23 = vld [vmem:[#allocation14] ss:$0 sm:$0xff] }
  0xfe   :  { %843 = vmatpush.msra.mxu0 %v713_v28 }
  0xff   :  { %823 = vmatpush.msrb.mxu3 %v712_v27  ;;  %863 = vmatpush.msra.mxu1 %v714_v29  ;;  %v724_v27 = vld [vmem:[%s1630_s9] sm:$0xff]  ;;  %s1454_s9 = smov [#allocation17]  }
 0x100   :  { %844 = vmatpush.msra.mxu0 %v705_v32  ;;  %v727_v28 = vperm.slane %v724_v27, 1  ;;  %v728_v29 = vperm.slane %v724_v27, 2  ;;  %s1067_s11 = sshll.u32 %s1454_s9, 4  ;;  %s1068_s11 = int_to_ptr.vmem [resolvable:$true] %s1067_s11 }
 0x101   :  { %824 = vmatpush.msrb.mxu3 %v704_v31  ;;  %864 = vmatpush.msra.mxu1 %v706_v33 }
 0x102   :  { %845 = vmatpush.msra.mxu0 %v697_v36 }
 0x103   :  { %825 = vmatpush.msrb.mxu3 %v696_v35  ;;  %v726_v35 = vperm.slane %v724_v27, 0 }
 0x104   :  { %846 = vmatpush.msra.mxu0 %v689_v40  ;;  %v732_v40 = vperm.slane %v724_v27, 6 }
 0x105   :  { %826 = vmatpush.msrb.mxu3 %v688_v39 }
 0x107   :  { %827 = vmatpush.msrb.mxu3 %v680_v43 }
 0x171   :  { %v545_v44 = vpop.f32.mrf.mxu1  ;;  %v525_v7 = vpop.f32.mrf.mxu0 }
 0x172   :  { %v546_v47 = vadd.f32 %v545_v44, %v505_v37  ;;  %v526_v16 = vadd.f32 %v525_v7, %v504_v4  ;;  %v698_v37 = vld [vmem:[#allocation16 + $0x330] sm:$0xff]  ;;  %v681_v44 = vld [vmem:[#allocation16 + $0x2a8] sm:$0xff]  ;;  %v624_v7 = vld [vmem:[#allocation16 + $0xe0] sm:$0xff] }
 0x173   :  { %865 = vmatpush.msra.mxu1 %v698_v37  ;;  %847 = vmatpush.msra.mxu0 %v681_v44  ;;  %v633_v4 = vld [vmem:[#allocation16 + $0x128] sm:$0xff]  ;;  %v729_v37 = vperm.slane %v724_v27, 3 }
 0x174   :  { %v548_v52 = vmul.f32 0.5, %v546_v47  ;;  %v672_v47 = vld [vmem:[#allocation16 + $0x260] sm:$0xff] }
 0x175   :  { %866 = vmatpush.msra.mxu1 %v690_v41  ;;  %828 = vmatpush.msrb.mxu3 %v672_v47 }
 0x176   :  { %v549_v57 = vmul.f32 1.442695, %v548_v52  ;;  %v665_v52 = vld [vmem:[#allocation16 + $0x228] sm:$0xff]  ;;  %848 = vmatpush.msra.mxu0 %v673_v48 }
 0x177   :  { %867 = vmatpush.msra.mxu1 %v682_v45  ;;  %829 = vmatpush.msrb.mxu3 %v664_v51 }
 0x178   :  { %1126 = vpow2.f32 %v549_v57  ;;  %v658_v57 = vld [vmem:[#allocation16 + $0x1f0] sm:$0xff]  ;;  %849 = vmatpush.msra.mxu0 %v665_v52 }
 0x179   :  { %868 = vmatpush.msra.mxu1 %v674_v49  ;;  %830 = vmatpush.msrb.mxu3 %v656_v55  ;;  %v730_v55 = vperm.slane %v724_v27, 4 }
 0x17a   :  { %850 = vmatpush.msra.mxu0 %v657_v56 }
 0x17b   :  { %869 = vmatpush.msra.mxu1 %v666_v53  ;;  %831 = vmatpush.msrb.mxu3 %v648_v59 }
 0x17c   :  { %851 = vmatpush.msra.mxu0 %v649_v60 }
 0x17d   :  { %870 = vmatpush.msra.mxu1 %v658_v57  ;;  %832 = vmatpush.msrb.mxu3 %v640_v63 }
 0x17e   :  { %v1127_v13 = vpop.eup %1126  ;;  %852 = vmatpush.msra.mxu0 %v641_v0 }
 0x17f   :  { %v552_v17 = vmul.f32 %v1127_v13, %v551_v8  ;;  %871 = vmatpush.msra.mxu1 %v650_v61  ;;  %833 = vmatpush.msrb.mxu3 %v632_v3  ;;  %v625_v8 = vld [vmem:[#allocation16 + $0xe8] sm:$0xff]  ;;  %v618_v13 = vld [vmem:[#allocation16 + $0xb0] sm:$0xff] }
 0x180   :  { %853 = vmatpush.msra.mxu0 %v633_v4 }
 0x181   :  { %v553_v21 = vadd.f32 %v552_v17, %v526_v16  ;;  %872 = vmatpush.msra.mxu1 %v642_v1  ;;  %834 = vmatpush.msrb.mxu3 %v624_v7  ;;  %v609_v16 = vld [vmem:[#allocation16 + $0x68] sm:$0xff]  ;;  %v610_v17 = vld [vmem:[#allocation16 + $0x70] sm:$0xff] }
 0x182   :  { %854 = vmatpush.msra.mxu0 %v625_v8 }
 0x183   :  { %591 = vmatmul.f32.vlgmr.msra.gmra.mxu2 %v553_v21  ;;  %554 = vst [vmem:[#allocation18] sm:$0xff] %v553_v21  ;;  %873 = vmatpush.msra.mxu1 %v634_v5  ;;  %v602_v21 = vld [vmem:[#allocation16 + $0x30] sm:$0xff] }
 0x184   :  { %882 = vmatpush.msra.mxu2 %v723_v26  ;;  %835 = vmatpush.msrb.mxu3 %v616_v11  ;;  %1083 = dma.vmem_to_hbm [thread:$0]  %s1079_s8, 128, %s1081_s7, [#allocation19]  }
 0x185   :  { %874 = vmatpush.msra.mxu1 %v626_v9  ;;  %855 = vmatpush.msra.mxu0 %v617_v12 }
 0x186   :  { %883 = vmatpush.msra.mxu2 %v715_v30  ;;  %836 = vmatpush.msrb.mxu3 %v608_v15 }
 0x187   :  { %875 = vmatpush.msra.mxu1 %v618_v13  ;;  %856 = vmatpush.msra.mxu0 %v609_v16 }
 0x188   :  { %884 = vmatpush.msra.mxu2 %v707_v34  ;;  %837 = vmatpush.msrb.mxu3 %v600_v19 }
 0x189   :  { %876 = vmatpush.msra.mxu1 %v610_v17  ;;  %857 = vmatpush.msra.mxu0 %v601_v20 }
 0x18a   :  { %885 = vmatpush.msra.mxu2 %v699_v38  ;;  %v731_v38 = vperm.slane %v724_v27, 5 }
 0x18b   :  { %877 = vmatpush.msra.mxu1 %v602_v21 }
 0x18c   :  { %886 = vmatpush.msra.mxu2 %v691_v42 }
 0x18e   :  { %887 = vmatpush.msra.mxu2 %v683_v46 }
 0x190   :  { %888 = vmatpush.msra.mxu2 %v675_v50 }
 0x192   :  { %889 = vmatpush.msra.mxu2 %v667_v54 }
 0x194   :  { %890 = vmatpush.msra.mxu2 %v659_v58 }
 0x196   :  { %891 = vmatpush.msra.mxu2 %v651_v62  ;;  %v733_v62 = vperm.slane %v724_v27, 7 }
 0x198   :  { %892 = vmatpush.msra.mxu2 %v643_v2 }
 0x19a   :  { %893 = vmatpush.msra.mxu2 %v635_v6 }
 0x19c   :  { %894 = vmatpush.msra.mxu2 %v627_v10 }
 0x19e   :  { %895 = vmatpush.msra.mxu2 %v619_v14 }
 0x1a0   :  { %896 = vmatpush.msra.mxu2 %v611_v18 }
 0x1a2   :  { %897 = vmatpush.msra.mxu2 %v603_v22 }
 0x206   :  { %v592_v24 = vpop.f32.mrf.mxu2 }
 0x207   :  { %v593_v25 = vadd.f32 %v1125_v23, %v592_v24 }
 0x209   :  { %v595_v26 = vmax.f32 %v593_v25, 0.0 }
 0x20b   :  { %758 = vmatmul.f32.vlgmr.msra.gmra.mxu3 %v595_v26  ;;  %778 = vmatmul.f32.vlgmr.msrb.gmra.mxu0 %v595_v26 }
 0x20c   :  { %798 = vmatmul.f32.vlgmr.msrb.gmra.mxu1 %v595_v26  ;;  %818 = vmatmul.f32.vlgmr.msrb.gmra.mxu2 %v595_v26 }
 0x213   :  { %838 = vmatmul.f32.vlgmr.msrb.gmra.mxu3 %v595_v26  ;;  %858 = vmatmul.f32.vlgmr.msra.gmra.mxu0 %v595_v26 }
 0x214   :  { %878 = vmatmul.f32.vlgmr.msra.gmra.mxu1 %v595_v26  ;;  %898 = vmatmul.f32.vlgmr.msra.gmra.mxu2 %v595_v26 }
 0x288   :  { %v779_v30 = vpop.f32.mrf.mxu0 }
 0x289   :  { %v780_v31 = vadd.f32 %v779_v30, %v727_v28  ;;  %v799_v32 = vpop.f32.mrf.mxu1 }
 0x28a   :  { %v800_v33 = vadd.f32 %v799_v32, %v728_v29 }
 0x28b   :  { %v1100_v34 = vmul.f32 -1.442695, %v780_v31 }
 0x28c   :  { %v1101_v36 = vmul.f32 -1.442695, %v800_v33 }
 0x28d   :  { %1128 = vpow2.f32 %v1100_v34 }
 0x28e   :  { %1130 = vpow2.f32 %v1101_v36  ;;  %v759_v39 = vpop.f32.mrf.mxu3 }
 0x28f   :  { %v760_v41 = vadd.f32 %v759_v39, %v726_v35  ;;  %v819_v42 = vpop.f32.mrf.mxu2 }
 0x290   :  { %v820_v43 = vadd.f32 %v819_v42, %v729_v37  ;;  %v859_v44 = vpop.f32.mrf.mxu0 }
 0x291   :  { %v1099_v45 = vmul.f32 -1.442695, %v760_v41  ;;  %v860_v46 = vadd.f32 %v859_v44, %v731_v38  ;;  %v879_v47 = vpop.f32.mrf.mxu1 }
 0x292   :  { %v1102_v48 = vmul.f32 -1.442695, %v820_v43  ;;  %v880_v49 = vadd.f32 %v879_v47, %v732_v40 }
 0x293   :  { %v1129_v50 = vpop.eup %1128  ;;  %1132 = vpow2.f32 %v1099_v45  ;;  %v1104_v51 = vmul.f32 -1.442695, %v860_v46 }
 0x294   :  { %v1131_v52 = vpop.eup %1130  ;;  %v927_v53 = vadd.f32 1.0, %v1129_v50  ;;  %1134 = vpow2.f32 %v1102_v48  ;;  %v1105_v54 = vmul.f32 -1.442695, %v880_v49 }
 0x295   :  { %v928_v56 = vadd.f32 1.0, %v1131_v52  ;;  %1136 = vpow2.f32 %v1104_v51 }
 0x296   :  { %1138 = vrcp.f32 %v927_v53  ;;  %v839_v57 = vpop.f32.mrf.mxu3  ;;  %v958_v0 = vand.u32 2147483647, %v927_v53  ;;  %v960_v1 = vand.u32 2147483648, %v927_v53  ;;  %vm954_vm0 = vweird.f32 %v927_v53 }
 0x297   :  { %1140 = vrcp.f32 %v928_v56  ;;  %v840_v58 = vadd.f32 %v839_v57, %v730_v55  ;;  %v899_v3 = vpop.f32.mrf.mxu2  ;;  %v973_v5 = vand.u32 2147483647, %v928_v56  ;;  %v975_v9 = vand.u32 2147483648, %v928_v56 }
 0x298   :  { %1142 = vpow2.f32 %v1105_v54  ;;  %vm969_vm1 = vweird.f32 %v928_v56  ;;  %v900_v12 = vadd.f32 %v899_v3, %v733_v62  ;;  %vm1558_vm2 = vcmp.eq.f32.partialorder %v958_v0, 8.507059e+37 }
 0x299   :  { %v1133_v59 = vpop.eup %1132  ;;  %v1103_v6 = vmul.f32 -1.442695, %v840_v58  ;;  %v961_v15 = vor.u32 1.1754944e-38, %v960_v1  ;;  %vm1564_vm3 = vcmp.eq.f32.partialorder %v973_v5, 8.507059e+37  ;;  %v976_v21 = vor.u32 1.1754944e-38, %v975_v9 }
 0x29a   :  { %v1135_v60 = vpop.eup %1134  ;;  %v1552_v61 = vadd.f32 1.0, %v1133_v59  ;;  %v1106_v25 = vmul.f32 -1.442695, %v900_v12 }
 0x29b   :  { %v1137_v63 = vpop.eup %1136  ;;  %v1554_v2 = vadd.f32 1.0, %v1135_v60 }
 0x29c   :  { %v1139_v4 = vpop.eup %1138  ;;  %1144 = vrcp.f32 %v1552_v61  ;;  %v1562_v16 = vadd.f32 1.0, %v1137_v63  ;;  %v943_v24 = vand.u32 2147483647, %v1552_v61  ;;  %vm939_vm6 = vweird.f32 %v1552_v61 }
 0x29d   :  { %v1141_v7 = vpop.eup %1140  ;;  %v950_v8 = vmul.f32 %v1139_v4, %v927_v53  ;;  %1146 = vrcp.f32 %v1554_v2  ;;  %vm955_vm4 = vweird.f32 %v1139_v4  ;;  %v945_v30 = vand.u32 2147483648, %v1552_v61 }
 0x29e   :  { %v1143_v10 = vpop.eup %1142  ;;  %v965_v11 = vmul.f32 %v1141_v7, %v928_v56  ;;  %1148 = vpow2.f32 %v1103_v6  ;;  %vm970_vm5 = vweird.f32 %v1141_v7  ;;  %vm956_vm7 = vmor %vm954_vm0, %vm955_vm4  ;;  %vm984_vm8 = vweird.f32 %v1554_v2 }
 0x29f   :  { %v951_v13 = vsub.f32 1.0, %v950_v8  ;;  %v1568_v19 = vadd.f32 1.0, %v1143_v10  ;;  %1150 = vrcp.f32 %v1562_v16  ;;  %vm971_vm9 = vmor %vm969_vm1, %vm970_vm5  ;;  %v988_v34 = vand.u32 2147483647, %v1554_v2 }
 0x2a0   :  { %v966_v17 = vsub.f32 1.0, %v965_v11  ;;  %v990_v35 = vand.u32 2147483648, %v1554_v2  ;;  %vm1584_vm10 = vcmp.eq.f32.partialorder %v943_v24, 8.507059e+37  ;;  %v946_v45 = vor.u32 1.1754944e-38, %v945_v30 }
 0x2a1   :  { %v952_v20 = vmul.f32 %v1139_v4, %v951_v13  ;;  %1152 = vrcp.f32 %v1568_v19  ;;  %vm1593_vm13 = vcmp.eq.f32.partialorder %v988_v34, 8.507059e+37  ;;  %v1018_v54 = vand.u32 2147483647, %v1562_v16 }
 0x2a2   :  { %v1145_v22 = vpop.eup %1144  ;;  %v967_v23 = vmul.f32 %v1141_v7, %v966_v17  ;;  %v991_v51 = vor.u32 1.1754944e-38, %v990_v35  ;;  %v1020_v57 = vand.u32 2147483648, %v1562_v16  ;;  %vm1014_vm1 = vweird.f32 %v1562_v16 }
 0x2a3   :  { %v1147_v26 = vpop.eup %1146  ;;  %v953_v27 = vadd.f32 %v1139_v4, %v952_v20  ;;  %v935_v28 = vmul.f32 %v1145_v22, %v1552_v61  ;;  %vm940_vm11 = vweird.f32 %v1145_v22  ;;  %v1035_v63 = vand.u32 2147483648, %v1568_v19 }
 0x2a4   :  { %v968_v29 = vadd.f32 %v1141_v7, %v967_v23  ;;  %v980_v31 = vmul.f32 %v1147_v26, %v1554_v2  ;;  %v1149_v36 = vpop.eup %1148  ;;  %vm985_vm12 = vweird.f32 %v1147_v26  ;;  %vm941_vm14 = vmor %vm939_vm6, %vm940_vm11  ;;  %v1033_v2 = vand.u32 2147483647, %v1568_v19 }
 0x2a5   :  { %v957_v32 = vsel %vm956_vm7, %v1139_v4, %v953_v27  ;;  %v936_v33 = vsub.f32 1.0, %v935_v28  ;;  %v1151_v41 = vpop.eup %1150  ;;  %v1590_v44 = vadd.f32 1.0, %v1149_v36  ;;  %vm986_vm15 = vmor %vm984_vm8, %vm985_vm12  ;;  %vm1019_vm4 = vcmp.eq.f32.partialorder %v1018_v54, 8.507059e+37 }
 0x2a6   :  { %v962_v37 = vsel %vm1558_vm2, %v961_v15, %v957_v32  ;;  %v972_v38 = vsel %vm971_vm9, %v1141_v7, %v968_v29  ;;  %v981_v40 = vsub.f32 1.0, %v980_v31  ;;  %v1010_v47 = vmul.f32 %v1151_v41, %v1562_v16 }
 0x2a7   :  { %1055 = vst [vmem:[#allocation17 + $0x8] sm:$0xff] %v962_v37  ;;  %v977_v42 = vsel %vm1564_vm3, %v976_v21, %v972_v38  ;;  %v937_v43 = vmul.f32 %v1145_v22, %v936_v33  ;;  %v1153_v48 = vpop.eup %1152  ;;  %1154 = vrcp.f32 %v1590_v44  ;;  %vm1015_vm0 = vweird.f32 %v1151_v41 }
 0x2a8   :  { %1056 = vst [vmem:[#allocation17 + $0x10] sm:$0xff] %v977_v42  ;;  %v982_v46 = vmul.f32 %v1147_v26, %v981_v40  ;;  %v1011_v53 = vsub.f32 1.0, %v1010_v47  ;;  %v1025_v55 = vmul.f32 %v1153_v48, %v1568_v19  ;;  %1156 = vpow2.f32 %v1106_v25  ;;  %vm1016_vm3 = vmor %vm1014_vm1, %vm1015_vm0 }
 0x2a9   :  { %v938_v49 = vadd.f32 %v1145_v22, %v937_v43  ;;  %vm1030_vm2 = vweird.f32 %v1153_v48  ;;  %v1021_v4 = vor.u32 1.1754944e-38, %v1020_v57  ;;  %vm1029_vm5 = vweird.f32 %v1568_v19 }
 0x2aa   :  { %v983_v52 = vadd.f32 %v1147_v26, %v982_v46  ;;  %v1012_v60 = vmul.f32 %v1151_v41, %v1011_v53  ;;  %v1026_v61 = vsub.f32 1.0, %v1025_v55  ;;  %vm1031_vm6 = vmor %vm1029_vm5, %vm1030_vm2  ;;  %v1036_v10 = vor.u32 1.1754944e-38, %v1035_v63 }
 0x2ab   :  { %v942_v56 = vsel %vm941_vm14, %v1145_v22, %v938_v49  ;;  %vm1034_vm7 = vcmp.eq.f32.partialorder %v1033_v2, 8.507059e+37  ;;  %v1005_v15 = vand.u32 2147483648, %v1590_v44  ;;  %v1003_v17 = vand.u32 2147483647, %v1590_v44 }
 0x2ac   :  { %v947_v58 = vsel %vm1584_vm10, %v946_v45, %v942_v56  ;;  %v987_v59 = vsel %vm986_vm15, %v1147_v26, %v983_v52  ;;  %v1013_v0 = vadd.f32 %v1151_v41, %v1012_v60  ;;  %v1027_v1 = vmul.f32 %v1153_v48, %v1026_v61 }
 0x2ad   :  { %1054 = vst [vmem:[#allocation17] sm:$0xff] %v947_v58  ;;  %v992_v62 = vsel %vm1593_vm13, %v991_v51, %v987_v59  ;;  %v1155_v3 = vpop.eup %1154  ;;  %vm999_vm9 = vweird.f32 %v1590_v44  ;;  %v1006_v19 = vor.u32 1.1754944e-38, %v1005_v15  ;;  %vm1004_vm11 = vcmp.eq.f32.partialorder %v1003_v17, 8.507059e+37 }
 0x2ae   :  { %1057 = vst [vmem:[#allocation17 + $0x18] sm:$0xff] %v992_v62  ;;  %v1017_v5 = vsel %vm1016_vm3, %v1151_v41, %v1013_v0  ;;  %v1028_v6 = vadd.f32 %v1153_v48, %v1027_v1  ;;  %v995_v7 = vmul.f32 %v1155_v3, %v1590_v44  ;;  %v1157_v8 = vpop.eup %1156  ;;  %vm1000_vm8 = vweird.f32 %v1155_v3 }
 0x2af   :  { %v1022_v9 = vsel %vm1019_vm4, %v1021_v4, %v1017_v5  ;;  %v933_v13 = vadd.f32 1.0, %v1157_v8  ;;  %vm1001_vm10 = vmor %vm999_vm9, %vm1000_vm8 }
 0x2b0   :  { %1059 = vst [vmem:[#allocation17 + $0x28] sm:$0xff] %v1022_v9  ;;  %v1032_v11 = vsel %vm1031_vm6, %v1153_v48, %v1028_v6  ;;  %v996_v12 = vsub.f32 1.0, %v995_v7 }
 0x2b1   :  { %v1037_v14 = vsel %vm1034_vm7, %v1036_v10, %v1032_v11  ;;  %1158 = vrcp.f32 %v933_v13  ;;  %v1050_v25 = vand.u32 2147483648, %v933_v13  ;;  %v1048_v27 = vand.u32 2147483647, %v933_v13 }
 0x2b2   :  { %1060 = vst [vmem:[#allocation17 + $0x30] sm:$0xff] %v1037_v14  ;;  %v997_v16 = vmul.f32 %v1155_v3, %v996_v12  ;;  %vm1044_vm13 = vweird.f32 %v933_v13 }
 0x2b3   :  { %v1051_v29 = vor.u32 1.1754944e-38, %v1050_v25  ;;  %vm1049_vm15 = vcmp.eq.f32.partialorder %v1048_v27, 8.507059e+37 }
 0x2b4   :  { %v998_v18 = vadd.f32 %v1155_v3, %v997_v16 }
 0x2b6   :  { %v1002_v20 = vsel %vm1001_vm10, %v1155_v3, %v998_v18 }
 0x2b7   :  { %v1007_v21 = vsel %vm1004_vm11, %v1006_v19, %v1002_v20  ;;  %v1159_v22 = vpop.eup %1158 }
 0x2b8   :  { %1058 = vst [vmem:[#allocation17 + $0x20] sm:$0xff] %v1007_v21  ;;  %v1040_v23 = vmul.f32 %v1159_v22, %v933_v13  ;;  %vm1045_vm12 = vweird.f32 %v1159_v22 }
 0x2b9   :  { %vm1046_vm14 = vmor %vm1044_vm13, %vm1045_vm12 }
 0x2ba   :  { %v1041_v24 = vsub.f32 1.0, %v1040_v23 }
 0x2bc   :  { %v1042_v26 = vmul.f32 %v1159_v22, %v1041_v24 }
 0x2be   :  { %v1043_v28 = vadd.f32 %v1159_v22, %v1042_v26 }
 0x2c0   :  { %v1047_v30 = vsel %vm1046_vm14, %v1159_v22, %v1043_v28 }
 0x2c1   :  { %v1052_v31 = vsel %vm1049_vm15, %v1051_v29, %v1047_v30 }
 0x2c2   :  { %1061 = vst [vmem:[#allocation17 + $0x38] sm:$0xff] %v1052_v31 }
 0x2c3   :  { %1072 = dma.vmem_to_hbm [thread:$0]  %s1068_s11, 1024, %s1070_s26, [#allocation4]  }
 0x2c4   :  { %1434 = dma.done.wait [#allocation4], 1024  }
 0x2c5   :  { %1435 = vsyncadd [#allocation4], 4294966272 }
 0x2c6   :  { %1436 = dma.done.wait [#allocation19], 128  }
 0x2c7   :  { %1437 = vsyncadd [#allocation19], 4294967168 }
 0x2c8   :  { %1092 = vsyncpa [#allocation3], 1 }
 0x2c9   :  { %1093 = vsyncpa [#allocation6], 1 }
 0x2ca   :  { %1094 = vsyncpa [#allocation9], 1 }
 0x2cb   :  { %1095 = vsyncpa [#allocation12], 1 }
 0x2cc   :  { %1096 = vsyncpa [#allocation15], 1 }
 0x2cd   :  { %1097 = vsyncpa [#allocation4], 1 }
 0x2ce   :  { %1098 = vsyncpa [#allocation19], 1 }

</bundles_post_ra>
